<compile_context>
chip_gen: v7x
topology: tpu7x:2x2x1
jax: 0.10.0
libtpu: 0.0.40
codegen_flags: <defaults>
</compile_context>

<pallas_src>
import jax
import jax.numpy as jnp
from jax.experimental import pallas as pl
from jax.experimental.pallas import tpu as pltpu

PRODUCT_GROUP_EMB_DIM = 5
COLOR_GROUP_EMB_DIM = 16
INDEX_NAME_EMB_DIM = 3
TOTAL_EMB_DIM = PRODUCT_GROUP_EMB_DIM + COLOR_GROUP_EMB_DIM + INDEX_NAME_EMB_DIM
FOLD = 16                       # logical rows folded into the lane dim (16*24 = 384 lanes)
MAX_TILE_F = 1024               # folded rows per grid step cap (keeps VMEM ~<8 MiB)


def _round_up(x, m):
    return ((x + m - 1) // m) * m


def _products_nn_kernel(idx_ref, tab_ref, out_ref):
    """idx_ref: [TILE_F, 3*FOLD] int32, indices shifted into the folded vocab.
       tab_ref: [FOLD*V, FOLD*24] f32 replicated block-diagonal table.
       out_ref: [TILE_F, FOLD*24] f32 (lane-dense, multiple of 128)."""
    idx = idx_ref[...]                                   # [TILE_F, 48]
    tf, nidx = idx.shape
    vt = tab_ref.shape[0]

    iota = jax.lax.broadcasted_iota(jnp.int32, (tf, vt), 1)
    # Combined one-hot: 3*FOLD ones per folded row, in disjoint vocab ranges.
    hit = iota == idx[:, 0:1]
    for j in range(1, nidx):
        hit = hit | (iota == idx[:, j:j + 1])
    onehot = hit.astype(jnp.float32)                     # [TILE_F, FOLD*V]

    # Single fused gather-matmul on the MXU -> lane-dense output block.
    out_ref[...] = jnp.dot(onehot, tab_ref[...],
                           preferred_element_type=jnp.float32).astype(out_ref.dtype)


def prepare_products_nn(pg_table, cg_table, in_table):
    """Build the folded block-diagonal combined table ONCE (outside the hot path).

    Returns (folded_table [FOLD*V, FOLD*D] f32, (n_pg, n_cg, n_in))."""
    pg_table = jnp.asarray(pg_table, jnp.float32)
    cg_table = jnp.asarray(cg_table, jnp.float32)
    in_table = jnp.asarray(in_table, jnp.float32)
    n_pg, d_pg = pg_table.shape
    n_cg, d_cg = cg_table.shape
    n_in, d_in = in_table.shape
    V = n_pg + n_cg + n_in
    D = d_pg + d_cg + d_in

    base = jnp.zeros((V, D), jnp.float32)
    base = base.at[:n_pg, :d_pg].set(pg_table)
    base = base.at[n_pg:n_pg + n_cg, d_pg:d_pg + d_cg].set(cg_table)
    base = base.at[n_pg + n_cg:, d_pg + d_cg:].set(in_table)

    # Replicate FOLD times block-diagonally: kron(I_FOLD, base) -> [FOLD*V, FOLD*D].
    folded = jnp.kron(jnp.eye(FOLD, dtype=jnp.float32), base)
    return folded, (n_pg, n_cg, n_in)


def products_nn_forward(product_groups, color_groups, index_name, params, *,
                        tile_b=8192):
    """product_groups / color_groups / index_name: int [B] (or [B, 1]).
    params: output of prepare_products_nn.  tile_b: logical rows per grid step."""
    folded_table, (n_pg, n_cg, n_in) = params
    V = n_pg + n_cg + n_in
    G = FOLD
    Vt, Dt = folded_table.shape            # (G*V, G*D)
    D = Dt // G

    pg = jnp.asarray(product_groups, jnp.int32).reshape(-1)
    cg = jnp.asarray(color_groups, jnp.int32).reshape(-1)
    ix = jnp.asarray(index_name, jnp.int32).reshape(-1)
    B = pg.shape[0]

    # Indices shifted into the combined vocab (disjoint one-hot ranges).
    idx = jnp.stack([pg, cg + n_pg, ix + n_pg + n_cg], axis=-1)     # [B, 3]

    # Folded-row tiling.  TILE_F folded rows == G*TILE_F logical rows per step.
    nF_min = -(-B // G)                                             # ceil(B / G)
    tile_f_req = max(8, _round_up(max(tile_b, 1) // G, 8))
    TILE_F = min(tile_f_req, _round_up(nF_min, 8), MAX_TILE_F)
    nF_pad = _round_up(nF_min, TILE_F)
    B_pad = nF_pad * G
    if B_pad != B:
        # Zero-padded rows hit vocab index r*V (pg row 0) -- harmless, sliced off.
        idx = jnp.pad(idx, ((0, B_pad - B), (0, 0)))

    # Fold 16 logical rows into the lane dimension: [nF_pad, G, 3] + r*V -> [nF_pad, 48].
    offs = (jnp.arange(G, dtype=jnp.int32) * V)[None, :, None]
    idx48 = (idx.reshape(nF_pad, G, 3) + offs).reshape(nF_pad, G * 3)

    grid = (nF_pad // TILE_F,)

    out = pl.pallas_call(
        _products_nn_kernel,
        out_shape=jax.ShapeDtypeStruct((nF_pad, Dt), jnp.float32),
        grid=grid,
        in_specs=[
            pl.BlockSpec((TILE_F, G * 3), lambda i: (i, 0)),   # folded indices, tiled on batch
            pl.BlockSpec((Vt, Dt), lambda i: (0, 0)),          # folded table, resident
        ],
        out_specs=pl.BlockSpec((TILE_F, Dt), lambda i: (i, 0)),
        compiler_params=pltpu.CompilerParams(
            dimension_semantics=("parallel",)),
        cost_estimate=pl.CostEstimate(
            flops=2 * nF_pad * Vt * Dt,
            transcendentals=0,
            bytes_accessed=nF_pad * (G * 3 * 4 + Dt * 4) + Vt * Dt * 4),
    )(idx48, folded_table)

    # [nF_pad, G*D] f32 is row-major contiguous -> free reshape back to [B_pad, D].
    out = out.reshape(B_pad, D)[:B]
    # torch.squeeze removes all size-1 dims from the concatenated result.
    return jnp.squeeze(out)


if __name__ == "__main__":
    num_product_groups = 8
    num_color_groups = 16
    num_index_name = 4
    B = 8

    key = jax.random.PRNGKey(0)
    k_pg, k_cg, k_in, k_i1, k_i2, k_i3 = jax.random.split(key, 6)

    # nn.Embedding default init: weight ~ N(0, 1)
    pg_table = jax.random.normal(k_pg, (num_product_groups, PRODUCT_GROUP_EMB_DIM), jnp.float32)
    cg_table = jax.random.normal(k_cg, (num_color_groups, COLOR_GROUP_EMB_DIM), jnp.float32)
    in_table = jax.random.normal(k_in, (num_index_name, INDEX_NAME_EMB_DIM), jnp.float32)

    # Hoisted table preparation (done once, not per forward call).
    params = prepare_products_nn(pg_table, cg_table, in_table)
    params = jax.block_until_ready(params)

    product_groups = jax.random.randint(k_i1, (B,), 0, num_product_groups, jnp.int32)
    color_groups = jax.random.randint(k_i2, (B,), 0, num_color_groups, jnp.int32)
    index_name = jax.random.randint(k_i3, (B,), 0, num_index_name, jnp.int32)

    out = products_nn_forward(product_groups, color_groups, index_name, params)
    out = jax.block_until_ready(out)

    # Reference check in plain JAX (embedding lookup + concat + squeeze).
    ref = jnp.concatenate([pg_table[product_groups],
                           cg_table[color_groups],
                           in_table[index_name]], axis=-1)
    ref = jnp.squeeze(ref)
    assert out.shape == (B, TOTAL_EMB_DIM), out.shape
    assert jnp.allclose(out, ref, atol=1e-5), "mismatch vs reference"

    # Also exercise a larger, non-multiple-of-fold/tile batch to verify the grid path.
    B2 = 1000
    k_j1, k_j2, k_j3 = jax.random.split(jax.random.PRNGKey(1), 3)
    pg2 = jax.random.randint(k_j1, (B2,), 0, num_product_groups, jnp.int32)
    cg2 = jax.random.randint(k_j2, (B2,), 0, num_color_groups, jnp.int32)
    in2 = jax.random.randint(k_j3, (B2,), 0, num_index_name, jnp.int32)
    out2 = jax.block_until_ready(
        products_nn_forward(pg2, cg2, in2, params))
    ref2 = jnp.concatenate([pg_table[pg2], cg_table[cg2], in_table[in2]], axis=-1)
    assert out2.shape == (B2, TOTAL_EMB_DIM), out2.shape
    assert jnp.allclose(out2, ref2, atol=1e-5), "mismatch vs reference (large batch)"

    print("KERNEL_OK")
</pallas_src>

<mosaic_0001>
module attributes {stable_mosaic.version = 11 : i64} {
  func.func @_products_nn_kernel(%arg0: i32, %arg1: memref<8x48xi32, #tpu.memory_space<vmem>>, %arg2: memref<448x384xf32, #tpu.memory_space<vmem>>, %arg3: memref<8x384xf32, #tpu.memory_space<vmem>>) attributes {dimension_semantics = [#tpu.dimension_semantics<parallel>], iteration_bounds = array<i64: 1>, scalar_prefetch = 0 : i64, scratch_operands = 0 : i64, tpu.core_type = #tpu.core_type<tc>, window_params = [{transform_indices = @transform_0, window_bounds = array<i64: 8, 48>}, {pipeline_mode = #tpu.pipeline_mode<synchronous>, transform_indices = @transform_1, window_bounds = array<i64: 448, 384>}, {transform_indices = @transform_2, window_bounds = array<i64: 8, 384>}]} {
    %c0 = arith.constant 0 : index
    %c0_0 = arith.constant 0 : index
    %0 = vector.load %arg1[%c0, %c0_0] : memref<8x48xi32, #tpu.memory_space<vmem>>, vector<8x48xi32>
    %1 = tpu.iota {dimensions = array<i32: 1>} : vector<8x448xi32>
    %2 = vector.extract_strided_slice %0 {offsets = [0, 0], sizes = [8, 1], strides = [1, 1]} : vector<8x48xi32> to vector<8x1xi32>
    %3 = vector.broadcast %2 : vector<8x1xi32> to vector<8x448xi32>
    %4 = arith.cmpi eq, %1, %3 : vector<8x448xi32>
    %5 = vector.extract_strided_slice %0 {offsets = [0, 1], sizes = [8, 1], strides = [1, 1]} : vector<8x48xi32> to vector<8x1xi32>
    %6 = vector.broadcast %5 : vector<8x1xi32> to vector<8x448xi32>
    %7 = arith.cmpi eq, %1, %6 : vector<8x448xi32>
    %8 = arith.ori %4, %7 : vector<8x448xi1>
    %9 = vector.extract_strided_slice %0 {offsets = [0, 2], sizes = [8, 1], strides = [1, 1]} : vector<8x48xi32> to vector<8x1xi32>
    %10 = vector.broadcast %9 : vector<8x1xi32> to vector<8x448xi32>
    %11 = arith.cmpi eq, %1, %10 : vector<8x448xi32>
    %12 = arith.ori %8, %11 : vector<8x448xi1>
    %13 = vector.extract_strided_slice %0 {offsets = [0, 3], sizes = [8, 1], strides = [1, 1]} : vector<8x48xi32> to vector<8x1xi32>
    %14 = vector.broadcast %13 : vector<8x1xi32> to vector<8x448xi32>
    %15 = arith.cmpi eq, %1, %14 : vector<8x448xi32>
    %16 = arith.ori %12, %15 : vector<8x448xi1>
    %17 = vector.extract_strided_slice %0 {offsets = [0, 4], sizes = [8, 1], strides = [1, 1]} : vector<8x48xi32> to vector<8x1xi32>
    %18 = vector.broadcast %17 : vector<8x1xi32> to vector<8x448xi32>
    %19 = arith.cmpi eq, %1, %18 : vector<8x448xi32>
    %20 = arith.ori %16, %19 : vector<8x448xi1>
    %21 = vector.extract_strided_slice %0 {offsets = [0, 5], sizes = [8, 1], strides = [1, 1]} : vector<8x48xi32> to vector<8x1xi32>
    %22 = vector.broadcast %21 : vector<8x1xi32> to vector<8x448xi32>
    %23 = arith.cmpi eq, %1, %22 : vector<8x448xi32>
    %24 = arith.ori %20, %23 : vector<8x448xi1>
    %25 = vector.extract_strided_slice %0 {offsets = [0, 6], sizes = [8, 1], strides = [1, 1]} : vector<8x48xi32> to vector<8x1xi32>
    %26 = vector.broadcast %25 : vector<8x1xi32> to vector<8x448xi32>
    %27 = arith.cmpi eq, %1, %26 : vector<8x448xi32>
    %28 = arith.ori %24, %27 : vector<8x448xi1>
    %29 = vector.extract_strided_slice %0 {offsets = [0, 7], sizes = [8, 1], strides = [1, 1]} : vector<8x48xi32> to vector<8x1xi32>
    %30 = vector.broadcast %29 : vector<8x1xi32> to vector<8x448xi32>
    %31 = arith.cmpi eq, %1, %30 : vector<8x448xi32>
    %32 = arith.ori %28, %31 : vector<8x448xi1>
    %33 = vector.extract_strided_slice %0 {offsets = [0, 8], sizes = [8, 1], strides = [1, 1]} : vector<8x48xi32> to vector<8x1xi32>
    %34 = vector.broadcast %33 : vector<8x1xi32> to vector<8x448xi32>
    %35 = arith.cmpi eq, %1, %34 : vector<8x448xi32>
    %36 = arith.ori %32, %35 : vector<8x448xi1>
    %37 = vector.extract_strided_slice %0 {offsets = [0, 9], sizes = [8, 1], strides = [1, 1]} : vector<8x48xi32> to vector<8x1xi32>
    %38 = vector.broadcast %37 : vector<8x1xi32> to vector<8x448xi32>
    %39 = arith.cmpi eq, %1, %38 : vector<8x448xi32>
    %40 = arith.ori %36, %39 : vector<8x448xi1>
    %41 = vector.extract_strided_slice %0 {offsets = [0, 10], sizes = [8, 1], strides = [1, 1]} : vector<8x48xi32> to vector<8x1xi32>
    %42 = vector.broadcast %41 : vector<8x1xi32> to vector<8x448xi32>
    %43 = arith.cmpi eq, %1, %42 : vector<8x448xi32>
    %44 = arith.ori %40, %43 : vector<8x448xi1>
    %45 = vector.extract_strided_slice %0 {offsets = [0, 11], sizes = [8, 1], strides = [1, 1]} : vector<8x48xi32> to vector<8x1xi32>
    %46 = vector.broadcast %45 : vector<8x1xi32> to vector<8x448xi32>
    %47 = arith.cmpi eq, %1, %46 : vector<8x448xi32>
    %48 = arith.ori %44, %47 : vector<8x448xi1>
    %49 = vector.extract_strided_slice %0 {offsets = [0, 12], sizes = [8, 1], strides = [1, 1]} : vector<8x48xi32> to vector<8x1xi32>
    %50 = vector.broadcast %49 : vector<8x1xi32> to vector<8x448xi32>
    %51 = arith.cmpi eq, %1, %50 : vector<8x448xi32>
    %52 = arith.ori %48, %51 : vector<8x448xi1>
    %53 = vector.extract_strided_slice %0 {offsets = [0, 13], sizes = [8, 1], strides = [1, 1]} : vector<8x48xi32> to vector<8x1xi32>
    %54 = vector.broadcast %53 : vector<8x1xi32> to vector<8x448xi32>
    %55 = arith.cmpi eq, %1, %54 : vector<8x448xi32>
    %56 = arith.ori %52, %55 : vector<8x448xi1>
    %57 = vector.extract_strided_slice %0 {offsets = [0, 14], sizes = [8, 1], strides = [1, 1]} : vector<8x48xi32> to vector<8x1xi32>
    %58 = vector.broadcast %57 : vector<8x1xi32> to vector<8x448xi32>
    %59 = arith.cmpi eq, %1, %58 : vector<8x448xi32>
    %60 = arith.ori %56, %59 : vector<8x448xi1>
    %61 = vector.extract_strided_slice %0 {offsets = [0, 15], sizes = [8, 1], strides = [1, 1]} : vector<8x48xi32> to vector<8x1xi32>
    %62 = vector.broadcast %61 : vector<8x1xi32> to vector<8x448xi32>
    %63 = arith.cmpi eq, %1, %62 : vector<8x448xi32>
    %64 = arith.ori %60, %63 : vector<8x448xi1>
    %65 = vector.extract_strided_slice %0 {offsets = [0, 16], sizes = [8, 1], strides = [1, 1]} : vector<8x48xi32> to vector<8x1xi32>
    %66 = vector.broadcast %65 : vector<8x1xi32> to vector<8x448xi32>
    %67 = arith.cmpi eq, %1, %66 : vector<8x448xi32>
    %68 = arith.ori %64, %67 : vector<8x448xi1>
    %69 = vector.extract_strided_slice %0 {offsets = [0, 17], sizes = [8, 1], strides = [1, 1]} : vector<8x48xi32> to vector<8x1xi32>
    %70 = vector.broadcast %69 : vector<8x1xi32> to vector<8x448xi32>
    %71 = arith.cmpi eq, %1, %70 : vector<8x448xi32>
    %72 = arith.ori %68, %71 : vector<8x448xi1>
    %73 = vector.extract_strided_slice %0 {offsets = [0, 18], sizes = [8, 1], strides = [1, 1]} : vector<8x48xi32> to vector<8x1xi32>
    %74 = vector.broadcast %73 : vector<8x1xi32> to vector<8x448xi32>
    %75 = arith.cmpi eq, %1, %74 : vector<8x448xi32>
    %76 = arith.ori %72, %75 : vector<8x448xi1>
    %77 = vector.extract_strided_slice %0 {offsets = [0, 19], sizes = [8, 1], strides = [1, 1]} : vector<8x48xi32> to vector<8x1xi32>
    %78 = vector.broadcast %77 : vector<8x1xi32> to vector<8x448xi32>
    %79 = arith.cmpi eq, %1, %78 : vector<8x448xi32>
    %80 = arith.ori %76, %79 : vector<8x448xi1>
    %81 = vector.extract_strided_slice %0 {offsets = [0, 20], sizes = [8, 1], strides = [1, 1]} : vector<8x48xi32> to vector<8x1xi32>
    %82 = vector.broadcast %81 : vector<8x1xi32> to vector<8x448xi32>
    %83 = arith.cmpi eq, %1, %82 : vector<8x448xi32>
    %84 = arith.ori %80, %83 : vector<8x448xi1>
    %85 = vector.extract_strided_slice %0 {offsets = [0, 21], sizes = [8, 1], strides = [1, 1]} : vector<8x48xi32> to vector<8x1xi32>
    %86 = vector.broadcast %85 : vector<8x1xi32> to vector<8x448xi32>
    %87 = arith.cmpi eq, %1, %86 : vector<8x448xi32>
    %88 = arith.ori %84, %87 : vector<8x448xi1>
    %89 = vector.extract_strided_slice %0 {offsets = [0, 22], sizes = [8, 1], strides = [1, 1]} : vector<8x48xi32> to vector<8x1xi32>
    %90 = vector.broadcast %89 : vector<8x1xi32> to vector<8x448xi32>
    %91 = arith.cmpi eq, %1, %90 : vector<8x448xi32>
    %92 = arith.ori %88, %91 : vector<8x448xi1>
    %93 = vector.extract_strided_slice %0 {offsets = [0, 23], sizes = [8, 1], strides = [1, 1]} : vector<8x48xi32> to vector<8x1xi32>
    %94 = vector.broadcast %93 : vector<8x1xi32> to vector<8x448xi32>
    %95 = arith.cmpi eq, %1, %94 : vector<8x448xi32>
    %96 = arith.ori %92, %95 : vector<8x448xi1>
    %97 = vector.extract_strided_slice %0 {offsets = [0, 24], sizes = [8, 1], strides = [1, 1]} : vector<8x48xi32> to vector<8x1xi32>
    %98 = vector.broadcast %97 : vector<8x1xi32> to vector<8x448xi32>
    %99 = arith.cmpi eq, %1, %98 : vector<8x448xi32>
    %100 = arith.ori %96, %99 : vector<8x448xi1>
    %101 = vector.extract_strided_slice %0 {offsets = [0, 25], sizes = [8, 1], strides = [1, 1]} : vector<8x48xi32> to vector<8x1xi32>
    %102 = vector.broadcast %101 : vector<8x1xi32> to vector<8x448xi32>
    %103 = arith.cmpi eq, %1, %102 : vector<8x448xi32>
    %104 = arith.ori %100, %103 : vector<8x448xi1>
    %105 = vector.extract_strided_slice %0 {offsets = [0, 26], sizes = [8, 1], strides = [1, 1]} : vector<8x48xi32> to vector<8x1xi32>
    %106 = vector.broadcast %105 : vector<8x1xi32> to vector<8x448xi32>
    %107 = arith.cmpi eq, %1, %106 : vector<8x448xi32>
    %108 = arith.ori %104, %107 : vector<8x448xi1>
    %109 = vector.extract_strided_slice %0 {offsets = [0, 27], sizes = [8, 1], strides = [1, 1]} : vector<8x48xi32> to vector<8x1xi32>
    %110 = vector.broadcast %109 : vector<8x1xi32> to vector<8x448xi32>
    %111 = arith.cmpi eq, %1, %110 : vector<8x448xi32>
    %112 = arith.ori %108, %111 : vector<8x448xi1>
    %113 = vector.extract_strided_slice %0 {offsets = [0, 28], sizes = [8, 1], strides = [1, 1]} : vector<8x48xi32> to vector<8x1xi32>
    %114 = vector.broadcast %113 : vector<8x1xi32> to vector<8x448xi32>
    %115 = arith.cmpi eq, %1, %114 : vector<8x448xi32>
    %116 = arith.ori %112, %115 : vector<8x448xi1>
    %117 = vector.extract_strided_slice %0 {offsets = [0, 29], sizes = [8, 1], strides = [1, 1]} : vector<8x48xi32> to vector<8x1xi32>
    %118 = vector.broadcast %117 : vector<8x1xi32> to vector<8x448xi32>
    %119 = arith.cmpi eq, %1, %118 : vector<8x448xi32>
    %120 = arith.ori %116, %119 : vector<8x448xi1>
    %121 = vector.extract_strided_slice %0 {offsets = [0, 30], sizes = [8, 1], strides = [1, 1]} : vector<8x48xi32> to vector<8x1xi32>
    %122 = vector.broadcast %121 : vector<8x1xi32> to vector<8x448xi32>
    %123 = arith.cmpi eq, %1, %122 : vector<8x448xi32>
    %124 = arith.ori %120, %123 : vector<8x448xi1>
    %125 = vector.extract_strided_slice %0 {offsets = [0, 31], sizes = [8, 1], strides = [1, 1]} : vector<8x48xi32> to vector<8x1xi32>
    %126 = vector.broadcast %125 : vector<8x1xi32> to vector<8x448xi32>
    %127 = arith.cmpi eq, %1, %126 : vector<8x448xi32>
    %128 = arith.ori %124, %127 : vector<8x448xi1>
    %129 = vector.extract_strided_slice %0 {offsets = [0, 32], sizes = [8, 1], strides = [1, 1]} : vector<8x48xi32> to vector<8x1xi32>
    %130 = vector.broadcast %129 : vector<8x1xi32> to vector<8x448xi32>
    %131 = arith.cmpi eq, %1, %130 : vector<8x448xi32>
    %132 = arith.ori %128, %131 : vector<8x448xi1>
    %133 = vector.extract_strided_slice %0 {offsets = [0, 33], sizes = [8, 1], strides = [1, 1]} : vector<8x48xi32> to vector<8x1xi32>
    %134 = vector.broadcast %133 : vector<8x1xi32> to vector<8x448xi32>
    %135 = arith.cmpi eq, %1, %134 : vector<8x448xi32>
    %136 = arith.ori %132, %135 : vector<8x448xi1>
    %137 = vector.extract_strided_slice %0 {offsets = [0, 34], sizes = [8, 1], strides = [1, 1]} : vector<8x48xi32> to vector<8x1xi32>
    %138 = vector.broadcast %137 : vector<8x1xi32> to vector<8x448xi32>
    %139 = arith.cmpi eq, %1, %138 : vector<8x448xi32>
    %140 = arith.ori %136, %139 : vector<8x448xi1>
    %141 = vector.extract_strided_slice %0 {offsets = [0, 35], sizes = [8, 1], strides = [1, 1]} : vector<8x48xi32> to vector<8x1xi32>
    %142 = vector.broadcast %141 : vector<8x1xi32> to vector<8x448xi32>
    %143 = arith.cmpi eq, %1, %142 : vector<8x448xi32>
    %144 = arith.ori %140, %143 : vector<8x448xi1>
    %145 = vector.extract_strided_slice %0 {offsets = [0, 36], sizes = [8, 1], strides = [1, 1]} : vector<8x48xi32> to vector<8x1xi32>
    %146 = vector.broadcast %145 : vector<8x1xi32> to vector<8x448xi32>
    %147 = arith.cmpi eq, %1, %146 : vector<8x448xi32>
    %148 = arith.ori %144, %147 : vector<8x448xi1>
    %149 = vector.extract_strided_slice %0 {offsets = [0, 37], sizes = [8, 1], strides = [1, 1]} : vector<8x48xi32> to vector<8x1xi32>
    %150 = vector.broadcast %149 : vector<8x1xi32> to vector<8x448xi32>
    %151 = arith.cmpi eq, %1, %150 : vector<8x448xi32>
    %152 = arith.ori %148, %151 : vector<8x448xi1>
    %153 = vector.extract_strided_slice %0 {offsets = [0, 38], sizes = [8, 1], strides = [1, 1]} : vector<8x48xi32> to vector<8x1xi32>
    %154 = vector.broadcast %153 : vector<8x1xi32> to vector<8x448xi32>
    %155 = arith.cmpi eq, %1, %154 : vector<8x448xi32>
    %156 = arith.ori %152, %155 : vector<8x448xi1>
    %157 = vector.extract_strided_slice %0 {offsets = [0, 39], sizes = [8, 1], strides = [1, 1]} : vector<8x48xi32> to vector<8x1xi32>
    %158 = vector.broadcast %157 : vector<8x1xi32> to vector<8x448xi32>
    %159 = arith.cmpi eq, %1, %158 : vector<8x448xi32>
    %160 = arith.ori %156, %159 : vector<8x448xi1>
    %161 = vector.extract_strided_slice %0 {offsets = [0, 40], sizes = [8, 1], strides = [1, 1]} : vector<8x48xi32> to vector<8x1xi32>
    %162 = vector.broadcast %161 : vector<8x1xi32> to vector<8x448xi32>
    %163 = arith.cmpi eq, %1, %162 : vector<8x448xi32>
    %164 = arith.ori %160, %163 : vector<8x448xi1>
    %165 = vector.extract_strided_slice %0 {offsets = [0, 41], sizes = [8, 1], strides = [1, 1]} : vector<8x48xi32> to vector<8x1xi32>
    %166 = vector.broadcast %165 : vector<8x1xi32> to vector<8x448xi32>
    %167 = arith.cmpi eq, %1, %166 : vector<8x448xi32>
    %168 = arith.ori %164, %167 : vector<8x448xi1>
    %169 = vector.extract_strided_slice %0 {offsets = [0, 42], sizes = [8, 1], strides = [1, 1]} : vector<8x48xi32> to vector<8x1xi32>
    %170 = vector.broadcast %169 : vector<8x1xi32> to vector<8x448xi32>
    %171 = arith.cmpi eq, %1, %170 : vector<8x448xi32>
    %172 = arith.ori %168, %171 : vector<8x448xi1>
    %173 = vector.extract_strided_slice %0 {offsets = [0, 43], sizes = [8, 1], strides = [1, 1]} : vector<8x48xi32> to vector<8x1xi32>
    %174 = vector.broadcast %173 : vector<8x1xi32> to vector<8x448xi32>
    %175 = arith.cmpi eq, %1, %174 : vector<8x448xi32>
    %176 = arith.ori %172, %175 : vector<8x448xi1>
    %177 = vector.extract_strided_slice %0 {offsets = [0, 44], sizes = [8, 1], strides = [1, 1]} : vector<8x48xi32> to vector<8x1xi32>
    %178 = vector.broadcast %177 : vector<8x1xi32> to vector<8x448xi32>
    %179 = arith.cmpi eq, %1, %178 : vector<8x448xi32>
    %180 = arith.ori %176, %179 : vector<8x448xi1>
    %181 = vector.extract_strided_slice %0 {offsets = [0, 45], sizes = [8, 1], strides = [1, 1]} : vector<8x48xi32> to vector<8x1xi32>
    %182 = vector.broadcast %181 : vector<8x1xi32> to vector<8x448xi32>
    %183 = arith.cmpi eq, %1, %182 : vector<8x448xi32>
    %184 = arith.ori %180, %183 : vector<8x448xi1>
    %185 = vector.extract_strided_slice %0 {offsets = [0, 46], sizes = [8, 1], strides = [1, 1]} : vector<8x48xi32> to vector<8x1xi32>
    %186 = vector.broadcast %185 : vector<8x1xi32> to vector<8x448xi32>
    %187 = arith.cmpi eq, %1, %186 : vector<8x448xi32>
    %188 = arith.ori %184, %187 : vector<8x448xi1>
    %189 = vector.extract_strided_slice %0 {offsets = [0, 47], sizes = [8, 1], strides = [1, 1]} : vector<8x48xi32> to vector<8x1xi32>
    %190 = vector.broadcast %189 : vector<8x1xi32> to vector<8x448xi32>
    %191 = arith.cmpi eq, %1, %190 : vector<8x448xi32>
    %192 = arith.ori %188, %191 : vector<8x448xi1>
    %193 = arith.extui %192 : vector<8x448xi1> to vector<8x448xi32>
    %194 = arith.sitofp %193 : vector<8x448xi32> to vector<8x448xf32>
    %c0_1 = arith.constant 0 : index
    %c0_2 = arith.constant 0 : index
    %195 = vector.load %arg2[%c0_1, %c0_2] : memref<448x384xf32, #tpu.memory_space<vmem>>, vector<448x384xf32>
    %cst = arith.constant dense<0.000000e+00> : vector<8x384xf32>
    %196 = tpu.matmul %194, %195, %cst {dimension_numbers = #tpu.dot_dimension_numbers<[1], [0], [0], [1], [0, 0, 1, 1], [], []>} : vector<8x448xf32>, vector<448x384xf32>, vector<8x384xf32> -> vector<8x384xf32>
    %c0_3 = arith.constant 0 : index
    %c0_4 = arith.constant 0 : index
    %197 = vector.load %arg3[%c0_3, %c0_4] : memref<8x384xf32, #tpu.memory_space<vmem>>, vector<8x384xf32>
    tpu.vector_store %arg3[%c0_3, %c0_4], %196 {strides = array<i32>} : memref<8x384xf32, #tpu.memory_space<vmem>>, vector<8x384xf32>,
    return
  }
  func.func @transform_0(%arg0: i32) -> (i32, i32) {
    %c0_i32 = arith.constant 0 : i32
    %c0_i32_0 = arith.constant 0 : i32
    return %arg0, %c0_i32 : i32, i32
  }
  func.func @transform_1(%arg0: i32) -> (i32, i32) {
    %c0_i32 = arith.constant 0 : i32
    %c0_i32_0 = arith.constant 0 : i32
    %c0_i32_1 = arith.constant 0 : i32
    return %c0_i32, %c0_i32_0 : i32, i32
  }
  func.func @transform_2(%arg0: i32) -> (i32, i32) {
    %c0_i32 = arith.constant 0 : i32
    %c0_i32_0 = arith.constant 0 : i32
    return %arg0, %c0_i32 : i32, i32
  }
}

</mosaic_0001>

<bundles_post_ra>
// kernel: tpu_custom_call.1
= control target key start
LH: loop header
LB: loop body
LE: loop exit
PB: predicated region body
PF: predicated region fallthrough
CT: control target
= control target key end

     0   :  { %7 = vsyncpa [#allocation3], 0  ;;  %s2359_s0 = inlined_call_operand.hbm [shape: s32[8,48], index: 0, kind: input, shape index: {}]   ;;  %s2360_s1 = inlined_call_operand.hbm [shape: f32[448,384], index: 1, kind: input, shape index: {}]   ;;  %s2361_s2 = inlined_call_operand.hbm [shape: f32[8,384], index: 2, kind: output, shape index: {}]  }
   0x1   :  { %8 = vsyncpa [#allocation6], 0 }
   0x2   :  { %9 = vsyncpa [#allocation4], 0  ;;  %s1447_s9 = smov [#allocation2]   ;;  %s1448_s11 = smov [#allocation5]  }
   0x3   :  { %s16_s10 = sshll.u32 %s1447_s9, 4  ;;  %s25_s12 = sshll.u32 %s1448_s11, 4  ;;  %s17_s10 = int_to_ptr.vmem [resolvable:$true] %s16_s10  ;;  %s1517_s12 = int_to_ptr.vmem [resolvable:$true] %s25_s12 }
   0x4   :  { %s1375_s15 = scalar_lea.hbm %s2359_s0, 128 }
   0x5   :  { %p1376_p0 = scmp.ne.s32.totalorder %s2359_s0, %s1375_s15  ;;  %p1379_p1 = scmp.lt.u32.totalorder %s1375_s15, %s2359_s0 }
   0x7   :  { %p1381_p2 = pnand %p1379_p1, %p1376_p0 }
   0x9   :  { %1384 = shalt.err (!%p1381_p2)
}
   0xa   :  { %s1385_s20 = scalar_lea.vmem %s17_s10, 128  ;;  %p1390_p4 = scmp.lt.s32.totalorder %s17_s10, %s17_s10 }
   0xb   :  { %p1386_p3 = scmp.ne.s32.totalorder %s17_s10, %s1385_s20  ;;  %p1391_p5 = scmp.lt.s32.totalorder %s1385_s20, %s1385_s20 }
   0xd   :  { %p1392_p6 = por %p1391_p5, %p1390_p4 }
   0xf   :  { %p1393_p7 = pnand %p1392_p6, %p1386_p3 }
  0x11   :  { %1396 = shalt.err (!%p1393_p7)
}
  0x12   :  { %19 = dma.hbm_to_vmem [thread:$0]  %s2359_s0, 128, %s17_s10, [#allocation3]  }
  0x13   :  { %s1397_s25 = scalar_lea.hbm %s2360_s1, 21504 }
  0x14   :  { %p1398_p8 = scmp.ne.s32.totalorder %s2360_s1, %s1397_s25  ;;  %p1401_p9 = scmp.lt.u32.totalorder %s1397_s25, %s2360_s1 }
  0x16   :  { %p1403_p10 = pnand %p1401_p9, %p1398_p8 }
  0x18   :  { %1406 = shalt.err (!%p1403_p10)
}
  0x19   :  { %s1407_s30 = scalar_lea.vmem %s1517_s12, 21504  ;;  %p1412_p12 = scmp.lt.s32.totalorder %s1517_s12, %s1517_s12 }
  0x1a   :  { %p1408_p11 = scmp.ne.s32.totalorder %s1517_s12, %s1407_s30  ;;  %p1413_p13 = scmp.lt.s32.totalorder %s1407_s30, %s1407_s30 }
  0x1c   :  { %p1414_p0 = por %p1413_p13, %p1412_p12 }
  0x1e   :  { %p1415_p1 = pnand %p1414_p0, %p1408_p11 }
  0x20   :  { %1418 = shalt.err (!%p1415_p1)
}
  0x21   :  { %s1449_s0 = smov 384   ;;  %s1450_s3 = smov 24  }
  0x22   :  { %31 = dma.hbm_to_vmem [thread:$0]  %s2360_s1, 21504, %s1517_s12, [#allocation6], %s1449_s0, %s1449_s0, %s1450_s3  }
  0x23   :  { %1441 = dma.done.wait [#allocation3], 128  }
  0x24   :  { %1442 = vsyncadd [#allocation3], 4294967168 }
  0x25   :  { %1443 = dma.done.wait [#allocation6], 21504  }
  0x26   :  { %1444 = vsyncadd [#allocation6], 4294945792  ;;  %v1451_v0 = vmov 2   ;;  %v1452_v1 = vmov 0   ;;  %v1548_v2 = vld [vmem:[#allocation2] sm:$0xff]  ;;  %v1453_v3 = vmov 3   ;;  %v39_v54 = vlaneseq }
  0x27   :  { %1329 = vset.pattern.permute.xlu1 %v1451_v0  ;;  %1327 = vset.pattern.permute.xlu0 %v1452_v1  ;;  %v1454_v4 = vmov 1   ;;  %v1455_v5 = vmov 4   ;;  %v1456_v6 = vmov 5   ;;  %v1457_v7 = vmov 6   ;;  %v577_v42 = vld [vmem:[#allocation5 + $0x8] sm:$0xff]  ;;  %v580_v43 = vld [vmem:[#allocation5 + $0x20] sm:$0xff] }
  0x28   :  { %63 = vperm.xlu1 %1329, %v1548_v2   ;;  %45 = vperm.xlu0 %1327, %v1548_v2   ;;  %v1458_v8 = vmov 8   ;;  %v1459_v9 = vmov 7   ;;  %v1460_v10 = vmov 11   ;;  %v1461_v11 = vmov 9   ;;  %v576_v45 = vld [vmem:[#allocation5] sm:$0xff]  ;;  %v579_v46 = vld [vmem:[#allocation5 + $0x18] sm:$0xff] }
  0x29   :  { %v1462_v12 = vmov 14   ;;  %v1463_v13 = vmov 10   ;;  %v1464_v14 = vmov 17   ;;  %v1465_v15 = vmov 12   ;;  %v583_v49 = vld [vmem:[#allocation5 + $0x38] sm:$0xff]  ;;  %v586_v50 = vld [vmem:[#allocation5 + $0x50] sm:$0xff] }
  0x2a   :  { %v1466_v16 = vmov 20   ;;  %v1467_v17 = vmov 13   ;;  %v1468_v18 = vmov 23   ;;  %v1469_v19 = vmov 15   ;;  %v582_v52 = vld [vmem:[#allocation5 + $0x30] sm:$0xff]  ;;  %v585_v53 = vld [vmem:[#allocation5 + $0x48] sm:$0xff] }
  0x2b   :  { %v1470_v20 = vmov 26   ;;  %v1471_v21 = vmov 16   ;;  %v1472_v22 = vmov 29   ;;  %v1473_v23 = vmov 18   ;;  %v589_v57 = vld [vmem:[#allocation5 + $0x68] sm:$0xff]  ;;  %v592_v58 = vld [vmem:[#allocation5 + $0x80] sm:$0xff] }
  0x2c   :  { %1330 = vset.pattern.permute.xlu1 %v1453_v3  ;;  %1328 = vset.pattern.permute.xlu0 %v1454_v4  ;;  %v1474_v24 = vmov 32   ;;  %v1475_v25 = vmov 19   ;;  %v1476_v26 = vmov 35   ;;  %v1477_v27 = vmov 21   ;;  %v588_v60 = vld [vmem:[#allocation5 + $0x60] sm:$0xff]  ;;  %v591_v61 = vld [vmem:[#allocation5 + $0x78] sm:$0xff] }
  0x2d   :  { %74 = vperm.xlu1 %1330, %v1548_v2   ;;  %52 = vperm.xlu0 %1328, %v1548_v2   ;;  %v1478_v28 = vmov 38   ;;  %v1479_v29 = vmov 22   ;;  %v1480_v30 = vmov 41   ;;  %v1481_v31 = vmov 24   ;;  %s1501_s1 = smov [#allocation7]  }
  0x2e   :  { %v1482_v32 = vmov 44   ;;  %v1483_v33 = vmov 25   ;;  %v1484_v34 = vmov 47   ;;  %v1485_v35 = vmov 27   ;;  %s1039_s6 = sshll.u32 %s1501_s1, 4  ;;  %s1040_s6 = int_to_ptr.vmem [resolvable:$true] %s1039_s6 }
  0x2f   :  { %v1486_v36 = vmov 28   ;;  %v1487_v37 = vmov 30   ;;  %v1488_v38 = vmov 31   ;;  %v1489_v39 = vmov 33   ;;  %s1419_s7 = scalar_lea.vmem %s1040_s6, 384  ;;  %p1424_p3 = scmp.lt.s32.totalorder %s1040_s6, %s1040_s6 }
  0x30   :  { %v1490_v40 = vmov 34   ;;  %v1491_v41 = vmov 36   ;;  %v1090_v44 = vpack.c.bf16 %v580_v43, %v577_v42  ;;  %v1492_v47 = vmov 37   ;;  %p1420_p2 = scmp.ne.s32.totalorder %s1040_s6, %s1419_s7  ;;  %p1425_p4 = scmp.lt.s32.totalorder %s1419_s7, %s1419_s7 }
  0x31   :  { %1331 = vset.pattern.permute.xlu1 %v1455_v5  ;;  %1332 = vset.pattern.permute.xlu0 %v1456_v6  ;;  %v1092_v48 = vpack.c.bf16 %v579_v46, %v576_v45  ;;  %v1094_v51 = vpack.c.bf16 %v586_v50, %v583_v49  ;;  %v1096_v55 = vpack.c.bf16 %v585_v53, %v582_v52  ;;  %v1493_v56 = vmov 39   ;;  %v595_v5 = vld [vmem:[#allocation5 + $0x98] sm:$0xff]  ;;  %v598_v6 = vld [vmem:[#allocation5 + $0xb0] sm:$0xff]  ;;  %v616_v45 = vld [vmem:[#allocation5 + $0x140] sm:$0xff] }
  0x32   :  { %85 = vperm.xlu1 %1331, %v1548_v2   ;;  %96 = vperm.xlu0 %1332, %v1548_v2   ;;  %v1098_v59 = vpack.c.bf16 %v592_v58, %v589_v57  ;;  %v1593_v62 = vand.u32 127, %v39_v54  ;;  %v1100_v1 = vpack.c.bf16 %v591_v61, %v588_v60  ;;  %v1494_v3 = vmov 40   ;;  %v615_v49 = vld [vmem:[#allocation5 + $0x138] sm:$0xff]  ;;  %v622_v57 = vld [vmem:[#allocation5 + $0x170] sm:$0xff]  ;;  %v621_v61 = vld [vmem:[#allocation5 + $0x168] sm:$0xff]  ;;  %p1426_p5 = por %p1425_p4, %p1424_p3 }
  0x33   :  { %1091 = vmatprep.subr.bf16.mxu0 %v1090_v44  ;;  %v613_v44 = vld [vmem:[#allocation5 + $0x128] sm:$0xff]  ;;  %v618_v60 = vld [vmem:[#allocation5 + $0x150] sm:$0xff]  ;;  %v663_v54 = vld [vmem:[#allocation5 + $0x2b8] sm:$0xff] }
  0x34   :  { %1093 = vmatpush1.bf16.msra.mxu0 %v1092_v48  ;;  %v1597_v4 = vadd.s32 128, %v1593_v62  ;;  %v612_v48 = vld [vmem:[#allocation5 + $0x120] sm:$0xff]  ;;  %v590_v52 = vld [vmem:[#allocation5 + $0x70] sm:$0xff]  ;;  %p1427_p6 = pnand %p1426_p5, %p1420_p2 }
  0x35   :  { %1095 = vmatprep.subr.bf16.mxu0 %v1094_v51  ;;  %v1116_v51 = vpack.c.bf16 %v615_v49, %v612_v48  ;;  %v636_v48 = vld [vmem:[#allocation5 + $0x1e0] sm:$0xff]  ;;  %v639_v49 = vld [vmem:[#allocation5 + $0x1f8] sm:$0xff]  ;;  %v662_v50 = vld [vmem:[#allocation5 + $0x2b0] sm:$0xff] }
  0x36   :  { %1333 = vset.pattern.permute.xlu1 %v1457_v7  ;;  %1335 = vset.pattern.permute.xlu0 %v1458_v8  ;;  %v1600_v7 = vadd.s32 256, %v1593_v62 }
  0x37   :  { %107 = vperm.xlu1 %1333, %v1548_v2   ;;  %129 = vperm.xlu0 %1335, %v1548_v2  }
  0x38   :  { %1097 = vmatpush1.bf16.msra.mxu0 %v1096_v55  ;;  %v1498_v55 = vmov 46  }
  0x39   :  { %1099 = vmatprep.subr.bf16.mxu0 %v1098_v59 }
  0x3b   :  { %1334 = vset.pattern.permute.xlu1 %v1459_v9  ;;  %1338 = vset.pattern.permute.xlu0 %v1460_v10  ;;  %v1102_v10 = vpack.c.bf16 %v598_v6, %v595_v5  ;;  %v625_v5 = vld [vmem:[#allocation5 + $0x188] sm:$0xff]  ;;  %v628_v6 = vld [vmem:[#allocation5 + $0x1a0] sm:$0xff] }
  0x3c   :  { %118 = vperm.xlu1 %1334, %v1548_v2   ;;  %162 = vperm.xlu0 %1338, %v1548_v2  }
  0x3d   :  { %1101 = vmatpush1.bf16.msra.mxu0 %v1100_v1 }
  0x3e   :  { %1103 = vmatprep.subr.bf16.mxu0 %v1102_v10  ;;  %v626_v10 = vld [vmem:[#allocation5 + $0x190] sm:$0xff] }
  0x40   :  { %1336 = vset.pattern.permute.xlu1 %v1461_v11  ;;  %1341 = vset.pattern.permute.xlu0 %v1462_v12  ;;  %v594_v11 = vld [vmem:[#allocation5 + $0x90] sm:$0xff]  ;;  %v597_v12 = vld [vmem:[#allocation5 + $0xa8] sm:$0xff] }
  0x41   :  { %140 = vperm.xlu1 %1336, %v1548_v2   ;;  %195 = vperm.xlu0 %1341, %v1548_v2  }
  0x45   :  { %1337 = vset.pattern.permute.xlu1 %v1463_v13  ;;  %1344 = vset.pattern.permute.xlu0 %v1464_v14  ;;  %v1606_v13 = vadd.s32 384, %v1593_v62  ;;  %v1495_v14 = vmov 42  }
  0x46   :  { %151 = vperm.xlu1 %1337, %v1548_v2   ;;  %228 = vperm.xlu0 %1344, %v1548_v2  }
  0x4a   :  { %1339 = vset.pattern.permute.xlu1 %v1465_v15  ;;  %1347 = vset.pattern.permute.xlu0 %v1466_v16  ;;  %v1104_v16 = vpack.c.bf16 %v597_v12, %v594_v11  ;;  %v629_v11 = vld [vmem:[#allocation5 + $0x1a8] sm:$0xff]  ;;  %v624_v15 = vld [vmem:[#allocation5 + $0x180] sm:$0xff] }
  0x4b   :  { %173 = vperm.xlu1 %1339, %v1548_v2   ;;  %261 = vperm.xlu0 %1347, %v1548_v2   ;;  %v649_v12 = vld [vmem:[#allocation5 + $0x248] sm:$0xff] }
  0x4c   :  { %1105 = vmatpush1.bf16.msra.mxu0 %v1104_v16  ;;  %v627_v16 = vld [vmem:[#allocation5 + $0x198] sm:$0xff] }
  0x4f   :  { %1340 = vset.pattern.permute.xlu1 %v1467_v17  ;;  %1350 = vset.pattern.permute.xlu0 %v1468_v18  ;;  %v601_v17 = vld [vmem:[#allocation5 + $0xc8] sm:$0xff]  ;;  %v604_v18 = vld [vmem:[#allocation5 + $0xe0] sm:$0xff] }
  0x50   :  { %184 = vperm.xlu1 %1340, %v1548_v2   ;;  %294 = vperm.xlu0 %1350, %v1548_v2  }
  0x54   :  { %1342 = vset.pattern.permute.xlu1 %v1469_v19  ;;  %1353 = vset.pattern.permute.xlu0 %v1470_v20  ;;  %v1106_v20 = vpack.c.bf16 %v604_v18, %v601_v17  ;;  %v578_v18 = vld [vmem:[#allocation5 + $0x10] sm:$0xff]  ;;  %v581_v19 = vld [vmem:[#allocation5 + $0x28] sm:$0xff] }
  0x55   :  { %206 = vperm.xlu1 %1342, %v1548_v2   ;;  %327 = vperm.xlu0 %1353, %v1548_v2   ;;  %v653_v17 = vld [vmem:[#allocation5 + $0x268] sm:$0xff] }
  0x56   :  { %1107 = vmatprep.subr.bf16.mxu0 %v1106_v20 }
  0x59   :  { %1343 = vset.pattern.permute.xlu1 %v1471_v21  ;;  %1356 = vset.pattern.permute.xlu0 %v1472_v22  ;;  %v600_v21 = vld [vmem:[#allocation5 + $0xc0] sm:$0xff]  ;;  %v603_v22 = vld [vmem:[#allocation5 + $0xd8] sm:$0xff] }
  0x5a   :  { %217 = vperm.xlu1 %1343, %v1548_v2   ;;  %360 = vperm.xlu0 %1356, %v1548_v2  }
  0x5e   :  { %1345 = vset.pattern.permute.xlu1 %v1473_v23  ;;  %1359 = vset.pattern.permute.xlu0 %v1474_v24  ;;  %v634_v23 = vld [vmem:[#allocation5 + $0x1d0] sm:$0xff] }
  0x5f   :  { %239 = vperm.xlu1 %1345, %v1548_v2   ;;  %393 = vperm.xlu0 %1359, %v1548_v2  }
  0x63   :  { %1346 = vset.pattern.permute.xlu1 %v1475_v25  ;;  %1362 = vset.pattern.permute.xlu0 %v1476_v26  ;;  %v1108_v25 = vpack.c.bf16 %v603_v22, %v600_v21  ;;  %v631_v22 = vld [vmem:[#allocation5 + $0x1b8] sm:$0xff]  ;;  %v1124_v26 = vpack.c.bf16 %v627_v16, %v624_v15  ;;  %v650_v16 = vld [vmem:[#allocation5 + $0x250] sm:$0xff]  ;;  %v676_v15 = vld [vmem:[#allocation5 + $0x320] sm:$0xff] }
  0x64   :  { %250 = vperm.xlu1 %1346, %v1548_v2   ;;  %426 = vperm.xlu0 %1362, %v1548_v2   ;;  %v1218_v20 = vpack.c.bf16 %v653_v17, %v650_v16 }
  0x65   :  { %1109 = vmatpush1.bf16.msra.mxu0 %v1108_v25 }
  0x68   :  { %1348 = vset.pattern.permute.xlu1 %v1477_v27  ;;  %1365 = vset.pattern.permute.xlu0 %v1478_v28  ;;  %v1496_v28 = vmov 43   ;;  %v1204_v27 = vpack.c.bf16 %v581_v19, %v578_v18 }
  0x69   :  { %272 = vperm.xlu1 %1348, %v1548_v2   ;;  %459 = vperm.xlu0 %1365, %v1548_v2  }
  0x6d   :  { %1349 = vset.pattern.permute.xlu1 %v1479_v29  ;;  %1368 = vset.pattern.permute.xlu0 %v1480_v30  ;;  %v607_v29 = vld [vmem:[#allocation5 + $0xf8] sm:$0xff]  ;;  %v610_v30 = vld [vmem:[#allocation5 + $0x110] sm:$0xff] }
  0x6e   :  { %283 = vperm.xlu1 %1349, %v1548_v2   ;;  %492 = vperm.xlu0 %1368, %v1548_v2  }
  0x72   :  { %1351 = vset.pattern.permute.xlu1 %v1481_v31  ;;  %1371 = vset.pattern.permute.xlu0 %v1482_v32  ;;  %v1110_v32 = vpack.c.bf16 %v610_v30, %v607_v29  ;;  %v632_v29 = vld [vmem:[#allocation5 + $0x1c0] sm:$0xff]  ;;  %v635_v30 = vld [vmem:[#allocation5 + $0x1d8] sm:$0xff] }
  0x73   :  { %305 = vperm.xlu1 %1351, %v1548_v2   ;;  %525 = vperm.xlu0 %1371, %v1548_v2   ;;  %v655_v31 = vld [vmem:[#allocation5 + $0x278] sm:$0xff] }
  0x74   :  { %1111 = vmatprep.subr.bf16.mxu0 %v1110_v32  ;;  %v1206_v32 = vpack.c.bf16 %v635_v30, %v632_v29 }
  0x77   :  { %1352 = vset.pattern.permute.xlu1 %v1483_v33  ;;  %1374 = vset.pattern.permute.xlu0 %v1484_v34  ;;  %v630_v33 = vld [vmem:[#allocation5 + $0x1b0] sm:$0xff]  ;;  %v633_v34 = vld [vmem:[#allocation5 + $0x1c8] sm:$0xff] }
  0x78   :  { %316 = vperm.xlu1 %1352, %v1548_v2   ;;  %558 = vperm.xlu0 %1374, %v1548_v2  }
  0x7c   :  { %1354 = vset.pattern.permute.xlu1 %v1485_v35 }
  0x7d   :  { %338 = vperm.xlu1 %1354, %v1548_v2  }
  0x81   :  { %1355 = vset.pattern.permute.xlu1 %v1486_v36  ;;  %v606_v36 = vld [vmem:[#allocation5 + $0xf0] sm:$0xff] }
  0x82   :  { %349 = vperm.xlu1 %1355, %v1548_v2  }
  0x86   :  { %1357 = vset.pattern.permute.xlu1 %v1487_v37  ;;  %v609_v37 = vld [vmem:[#allocation5 + $0x108] sm:$0xff] }
  0x87   :  { %371 = vperm.xlu1 %1357, %v1548_v2   ;;  %v1112_v43 = vpack.c.bf16 %v609_v37, %v606_v36  ;;  %v1128_v36 = vpack.c.bf16 %v633_v34, %v630_v33  ;;  %v584_v37 = vld [vmem:[#allocation5 + $0x40] sm:$0xff] }
  0x88   :  { %v656_v34 = vld [vmem:[#allocation5 + $0x280] sm:$0xff] }
  0x89   :  { %1113 = vmatpush1.bf16.msra.mxu0 %v1112_v43 }
  0x8b   :  { %1358 = vset.pattern.permute.xlu1 %v1488_v38  ;;  %v587_v38 = vld [vmem:[#allocation5 + $0x58] sm:$0xff] }
  0x8c   :  { %382 = vperm.xlu1 %1358, %v1548_v2  }
  0x90   :  { %1360 = vset.pattern.permute.xlu1 %v1489_v39  ;;  %v637_v39 = vld [vmem:[#allocation5 + $0x1e8] sm:$0xff] }
  0x91   :  { %404 = vperm.xlu1 %1360, %v1548_v2  }
  0x95   :  { %1361 = vset.pattern.permute.xlu1 %v1490_v40  ;;  %v1497_v40 = vmov 45  }
  0x96   :  { %415 = vperm.xlu1 %1361, %v1548_v2  }
  0x9a   :  { %1363 = vset.pattern.permute.xlu1 %v1491_v41  ;;  %v638_v41 = vld [vmem:[#allocation5 + $0x1f0] sm:$0xff] }
  0x9b   :  { %437 = vperm.xlu1 %1363, %v1548_v2  }
  0x9f   :  { %1364 = vset.pattern.permute.xlu1 %v1492_v47  ;;  %v1114_v47 = vpack.c.bf16 %v616_v45, %v613_v44  ;;  %v1208_v44 = vpack.c.bf16 %v587_v38, %v584_v37  ;;  %v657_v37 = vld [vmem:[#allocation5 + $0x288] sm:$0xff] }
  0xa0   :  { %448 = vperm.xlu1 %1364, %v1548_v2  }
  0xa1   :  { %1115 = vmatprep.subr.bf16.mxu0 %v1114_v47 }
  0xa2   :  { %1117 = vmatpush1.bf16.msra.mxu0 %v1116_v51  ;;  %v1132_v51 = vpack.c.bf16 %v639_v49, %v636_v48 }
  0xa4   :  { %1366 = vset.pattern.permute.xlu1 %v1493_v56  ;;  %v619_v56 = vld [vmem:[#allocation5 + $0x158] sm:$0xff] }
  0xa5   :  { %470 = vperm.xlu1 %1366, %v1548_v2   ;;  %v1118_v59 = vpack.c.bf16 %v622_v57, %v619_v56  ;;  %v646_v56 = vld [vmem:[#allocation5 + $0x230] sm:$0xff]  ;;  %v617_v57 = vld [vmem:[#allocation5 + $0x148] sm:$0xff] }
  0xa7   :  { %v64_v63 = vpop.permute.xlu1 %63  ;;  %v46_v0 = vpop.permute.xlu0 %45  ;;  %1119 = vmatprep.subr.bf16.mxu0 %v1118_v59 }
  0xa8   :  { %vm47_vm0 = vcmp.eq.s32.totalorder %v1593_v62, %v46_v0  ;;  %vm48_vm1 = vcmp.eq.s32.totalorder %v1597_v4, %v46_v0  ;;  %vm49_vm2 = vcmp.eq.s32.totalorder %v1600_v7, %v46_v0  ;;  %vm50_vm6 = vcmp.eq.s32.totalorder %v1606_v13, %v46_v0 }
  0xa9   :  { %1367 = vset.pattern.permute.xlu1 %v1494_v3  ;;  %vm65_vm11 = vcmp.eq.s32.totalorder %v1593_v62, %v64_v63  ;;  %vm66_vm13 = vcmp.eq.s32.totalorder %v1597_v4, %v64_v63  ;;  %vm67_vm15 = vcmp.eq.s32.totalorder %v1600_v7, %v64_v63  ;;  %v642_v3 = vld [vmem:[#allocation5 + $0x210] sm:$0xff] }
  0xaa   :  { %481 = vperm.xlu1 %1367, %v1548_v2  }
  0xac   :  { %v1603_v8 = vpop.permute.xlu1 %74  ;;  %v53_v9 = vpop.permute.xlu0 %52 }
  0xad   :  { %vm54_vm3 = vcmp.eq.s32.totalorder %v1593_v62, %v53_v9  ;;  %vm55_vm4 = vcmp.eq.s32.totalorder %v1597_v4, %v53_v9  ;;  %vm56_vm5 = vcmp.eq.s32.totalorder %v1600_v7, %v53_v9  ;;  %vm57_vm7 = vcmp.eq.s32.totalorder %v1606_v13, %v53_v9 }
  0xae   :  { %1369 = vset.pattern.permute.xlu1 %v1495_v14  ;;  %vm1617_vm8 = vmor %vm47_vm0, %vm54_vm3  ;;  %vm76_vm3 = vcmp.eq.s32.totalorder %v1593_v62, %v1603_v8  ;;  %v1122_v9 = vpack.c.bf16 %v628_v6, %v625_v5  ;;  %v1202_v14 = vpack.c.bf16 %v629_v11, %v626_v10  ;;  %v645_v5 = vld [vmem:[#allocation5 + $0x228] sm:$0xff]  ;;  %v599_v10 = vld [vmem:[#allocation5 + $0xb8] sm:$0xff] }
  0xaf   :  { %503 = vperm.xlu1 %1369, %v1548_v2   ;;  %vm1624_vm9 = vmor %vm48_vm1, %vm55_vm4  ;;  %vm68_vm1 = vcmp.eq.s32.totalorder %v1606_v13, %v64_v63  ;;  %v1120_v63 = vpack.c.bf16 %v621_v61, %v618_v60  ;;  %v644_v60 = vld [vmem:[#allocation5 + $0x220] sm:$0xff]  ;;  %v647_v61 = vld [vmem:[#allocation5 + $0x238] sm:$0xff] }
  0xb0   :  { %vm1632_vm10 = vmor %vm49_vm2, %vm56_vm5  ;;  %vm77_vm5 = vcmp.eq.s32.totalorder %v1597_v4, %v1603_v8  ;;  %1203 = vmatprep.subr.bf16.mxu1 %v1202_v14  ;;  %v1214_v0 = vpack.c.bf16 %v647_v61, %v644_v60  ;;  %v652_v14 = vld [vmem:[#allocation5 + $0x260] sm:$0xff]  ;;  %v667_v60 = vld [vmem:[#allocation5 + $0x2d8] sm:$0xff] }
  0xb1   :  { %v86_v24 = vpop.permute.xlu1 %85  ;;  %vm1641_vm12 = vmor %vm50_vm6, %vm57_vm7  ;;  %vm78_vm7 = vcmp.eq.s32.totalorder %v1600_v7, %v1603_v8  ;;  %v97_v42 = vpop.permute.xlu0 %96  ;;  %1121 = vmatpush1.bf16.msra.mxu0 %v1120_v63  ;;  %1205 = vmatpush3.bf16.msra.mxu1 %v1204_v27  ;;  %v1138_v19 = vpack.c.bf16 %v652_v14, %v649_v12  ;;  %v602_v27 = vld [vmem:[#allocation5 + $0xd0] sm:$0xff]  ;;  %v623_v12 = vld [vmem:[#allocation5 + $0x178] sm:$0xff] }
  0xb2   :  { %vm1648_vm14 = vmor %vm1617_vm8, %vm65_vm11  ;;  %1123 = vmatprep.subr.bf16.mxu0 %v1122_v9  ;;  %1207 = vmatprep.subr.bf16.mxu1 %v1206_v32  ;;  %v596_v9 = vld [vmem:[#allocation5 + $0xa0] sm:$0xff]  ;;  %v658_v32 = vld [vmem:[#allocation5 + $0x290] sm:$0xff] }
  0xb3   :  { %1370 = vset.pattern.permute.xlu1 %v1496_v28  ;;  %vm1655_vm0 = vmor %vm1624_vm9, %vm66_vm13  ;;  %vm87_vm9 = vcmp.eq.s32.totalorder %v1593_v62, %v86_v24  ;;  %v1126_v28 = vpack.c.bf16 %v634_v23, %v631_v22  ;;  %v1216_v18 = vpack.c.bf16 %v599_v10, %v596_v9  ;;  %v648_v22 = vld [vmem:[#allocation5 + $0x240] sm:$0xff]  ;;  %v651_v23 = vld [vmem:[#allocation5 + $0x258] sm:$0xff]  ;;  %v1142_v38 = vpack.c.bf16 %v658_v32, %v655_v31 }
  0xb4   :  { %514 = vperm.xlu1 %1370, %v1548_v2   ;;  %vm1663_vm2 = vmor %vm1632_vm10, %vm67_vm15  ;;  %vm79_vm10 = vcmp.eq.s32.totalorder %v1606_v13, %v1603_v8  ;;  %vm90_vm15 = vcmp.eq.s32.totalorder %v1606_v13, %v86_v24  ;;  %v1136_v8 = vpack.c.bf16 %v645_v5, %v642_v3  ;;  %v670_v61 = vld [vmem:[#allocation5 + $0x2f0] sm:$0xff]  ;;  %v668_v3 = vld [vmem:[#allocation5 + $0x2e0] sm:$0xff] }
  0xb5   :  { %vm1671_vm4 = vmor %vm1641_vm12, %vm68_vm1  ;;  %vm88_vm12 = vcmp.eq.s32.totalorder %v1597_v4, %v86_v24  ;;  %1125 = vmatpush1.bf16.msra.mxu0 %v1124_v26  ;;  %1209 = vmatpush3.bf16.msra.mxu1 %v1208_v44  ;;  %v1140_v26 = vpack.c.bf16 %v651_v23, %v648_v22  ;;  %v671_v5 = vld [vmem:[#allocation5 + $0x2f8] sm:$0xff]  ;;  %v666_v9 = vld [vmem:[#allocation5 + $0x2d0] sm:$0xff] }
  0xb6   :  { %v1675_v35 = vpop.permute.xlu1 %107  ;;  %vm1681_vm6 = vmor %vm1648_vm14, %vm76_vm3  ;;  %vm89_vm14 = vcmp.eq.s32.totalorder %v1600_v7, %v86_v24  ;;  %v1817_v21 = vpop.permute.xlu0 %129  ;;  %1127 = vmatprep.subr.bf16.mxu0 %v1126_v28  ;;  %v605_v28 = vld [vmem:[#allocation5 + $0xe8] sm:$0xff]  ;;  %v680_v63 = vld [vmem:[#allocation5 + $0x340] sm:$0xff] }
  0xb7   :  { %vm1689_vm8 = vmor %vm1655_vm0, %vm77_vm5  ;;  %v1220_v30 = vpack.c.bf16 %v605_v28, %v602_v27  ;;  %v669_v10 = vld [vmem:[#allocation5 + $0x2e8] sm:$0xff] }
  0xb8   :  { %1372 = vset.pattern.permute.xlu1 %v1497_v40  ;;  %vm1698_vm11 = vmor %vm1663_vm2, %vm78_vm7  ;;  %vm98_vm2 = vcmp.eq.s32.totalorder %v1593_v62, %v97_v42  ;;  %vm101_vm7 = vcmp.eq.s32.totalorder %v1606_v13, %v97_v42  ;;  %v640_v40 = vld [vmem:[#allocation5 + $0x200] sm:$0xff]  ;;  %v673_v14 = vld [vmem:[#allocation5 + $0x308] sm:$0xff]  ;;  %v1152_v17 = vpack.c.bf16 %v669_v10, %v666_v9 }
  0xb9   :  { %536 = vperm.xlu1 %1372, %v1548_v2   ;;  %vm1706_vm13 = vmor %vm1671_vm4, %vm79_vm10  ;;  %vm99_vm4 = vcmp.eq.s32.totalorder %v1597_v4, %v97_v42  ;;  %vm109_vm10 = vcmp.eq.s32.totalorder %v1593_v62, %v1675_v35  ;;  %v1130_v45 = vpack.c.bf16 %v640_v40, %v637_v39  ;;  %1129 = vmatpush1.bf16.msra.mxu0 %v1128_v36  ;;  %v654_v36 = vld [vmem:[#allocation5 + $0x270] sm:$0xff] }
  0xba   :  { %vm1716_vm0 = vmor %vm1681_vm6, %vm87_vm9  ;;  %vm100_vm6 = vcmp.eq.s32.totalorder %v1600_v7, %v97_v42  ;;  %v641_v42 = vld [vmem:[#allocation5 + $0x208] sm:$0xff]  ;;  %v1144_v40 = vpack.c.bf16 %v657_v37, %v654_v36  ;;  %v682_v9 = vld [vmem:[#allocation5 + $0x350] sm:$0xff] }
  0xbb   :  { %vm1724_vm1 = vmor %vm1689_vm8, %vm88_vm12  ;;  %v1729_v53 = vpop.permute.xlu1 %118  ;;  %vm110_vm12 = vcmp.eq.s32.totalorder %v1597_v4, %v1675_v35  ;;  %v1210_v46 = vpack.c.bf16 %v641_v42, %v638_v41  ;;  %1131 = vmatprep.subr.bf16.mxu0 %v1130_v45  ;;  %v608_v41 = vld [vmem:[#allocation5 + $0x100] sm:$0xff]  ;;  %v611_v42 = vld [vmem:[#allocation5 + $0x118] sm:$0xff] }
  0xbc   :  { %vm1733_vm3 = vmor %vm1698_vm11, %vm89_vm14  ;;  %vm111_vm14 = vcmp.eq.s32.totalorder %v1600_v7, %v1675_v35  ;;  %v1224_v44 = vpack.c.bf16 %v611_v42, %v608_v41  ;;  %v661_v45 = vld [vmem:[#allocation5 + $0x2a8] sm:$0xff]  ;;  %v2457_v42 = vmov 0 }
  0xbd   :  { %1373 = vset.pattern.permute.xlu1 %v1498_v55  ;;  %vm1740_vm5 = vmor %vm1706_vm13, %vm90_vm15  ;;  %vm112_vm15 = vcmp.eq.s32.totalorder %v1606_v13, %v1675_v35  ;;  %1211 = vmatprep.subr.bf16.mxu1 %v1210_v46  ;;  %v643_v55 = vld [vmem:[#allocation5 + $0x218] sm:$0xff]  ;;  %v664_v46 = vld [vmem:[#allocation5 + $0x2c0] sm:$0xff] }
  0xbe   :  { %547 = vperm.xlu1 %1373, %v1548_v2   ;;  %vm102_vm8 = vmor %vm1716_vm0, %vm98_vm2  ;;  %vm120_vm2 = vcmp.eq.s32.totalorder %v1593_v62, %v1729_v53  ;;  %1133 = vmatpush1.bf16.msra.mxu0 %v1132_v51  ;;  %v1134_v59 = vpack.c.bf16 %v646_v56, %v643_v55  ;;  %v1910_v2 = vpop.permute.xlu0 %162  ;;  %v659_v35 = vld [vmem:[#allocation5 + $0x298] sm:$0xff]  ;;  %v1146_v49 = vpack.c.bf16 %v664_v46, %v661_v45  ;;  %v665_v51 = vld [vmem:[#allocation5 + $0x2c8] sm:$0xff]  ;;  %v2460_v46 = vmov 0 }
  0xbf   :  { %vm103_vm9 = vmor %vm1724_vm1, %vm99_vm4  ;;  %vm121_vm4 = vcmp.eq.s32.totalorder %v1597_v4, %v1729_v53  ;;  %v1222_v39 = vpack.c.bf16 %v659_v35, %v656_v34  ;;  %v614_v56 = vld [vmem:[#allocation5 + $0x130] sm:$0xff]  ;;  %v1226_v24 = vpack.c.bf16 %v665_v51, %v662_v50  ;;  %v2451_v34 = vmov 0 }
  0xc0   :  { %vm1759_vm11 = vmor %vm1733_vm3, %vm100_vm6  ;;  %v1773_v1 = vpop.permute.xlu1 %140  ;;  %vm122_vm6 = vcmp.eq.s32.totalorder %v1600_v7, %v1729_v53  ;;  %1135 = vmatprep.subr.bf16.mxu0 %v1134_v59  ;;  %v1228_v59 = vpack.c.bf16 %v617_v57, %v614_v56  ;;  %v2463_v51 = vmov 0 }
  0xc1   :  { %vm1767_vm13 = vmor %vm1740_vm5, %vm101_vm7  ;;  %vm123_vm7 = vcmp.eq.s32.totalorder %v1606_v13, %v1729_v53  ;;  %v593_v53 = vld [vmem:[#allocation5 + $0x88] sm:$0xff] }
  0xc2   :  { %vm1777_vm0 = vmor %vm102_vm8, %vm109_vm10  ;;  %v1212_v58 = vpack.c.bf16 %v593_v53, %v590_v52  ;;  %1137 = vmatpush1.bf16.msra.mxu0 %v1136_v8  ;;  %v1975_v52 = vpop.permute.xlu0 %195  ;;  %v660_v53 = vld [vmem:[#allocation5 + $0x2a0] sm:$0xff]  ;;  %v677_v8 = vld [vmem:[#allocation5 + $0x328] sm:$0xff] }
  0xc3   :  { %vm1781_vm1 = vmor %vm103_vm9, %vm110_vm12  ;;  %vm133_vm12 = vcmp.eq.s32.totalorder %v1600_v7, %v1817_v21  ;;  %1139 = vmatprep.subr.bf16.mxu0 %v1138_v19  ;;  %v1154_v19 = vpack.c.bf16 %v676_v15, %v673_v14  ;;  %v683_v14 = vld [vmem:[#allocation5 + $0x358] sm:$0xff] }
  0xc4   :  { %vm1789_vm3 = vmor %vm1759_vm11, %vm111_vm14  ;;  %vm142_vm14 = vcmp.eq.s32.totalorder %v1593_v62, %v1773_v1  ;;  %1213 = vmatpush3.bf16.msra.mxu1 %v1212_v58  ;;  %v1148_v58 = vpack.c.bf16 %v663_v54, %v660_v53  ;;  %v2466_v54 = vmov 0 }
  0xc5   :  { %vm1800_vm5 = vmor %vm1767_vm13, %vm112_vm15  ;;  %v1828_v25 = vpop.permute.xlu1 %151  ;;  %vm131_vm13 = vcmp.eq.s32.totalorder %v1593_v62, %v1817_v21  ;;  %vm134_vm15 = vcmp.eq.s32.totalorder %v1606_v13, %v1817_v21  ;;  %1215 = vmatprep.subr.bf16.mxu1 %v1214_v0  ;;  %v1150_v0 = vpack.c.bf16 %v670_v61, %v667_v60  ;;  %v672_v61 = vld [vmem:[#allocation5 + $0x300] sm:$0xff]  ;;  %v707_v60 = vld [vmem:[#allocation5 + $0x418] sm:$0xff] }
  0xc6   :  { %vm1813_vm8 = vmor %vm1777_vm0, %vm120_vm2  ;;  %vm144_vm2 = vcmp.eq.s32.totalorder %v1600_v7, %v1773_v1  ;;  %1141 = vmatpush1.bf16.msra.mxu0 %v1140_v26  ;;  %v2445_v26 = vmov 0 }
  0xc7   :  { %vm1824_vm9 = vmor %vm1781_vm1, %vm121_vm4  ;;  %1143 = vmatprep.subr.bf16.mxu0 %v1142_v38  ;;  %v2454_v38 = vmov 0 }
  0xc8   :  { %vm1835_vm10 = vmor %vm1789_vm3, %vm122_vm6  ;;  %vm145_vm3 = vcmp.eq.s32.totalorder %v1606_v13, %v1773_v1  ;;  %vm153_vm6 = vcmp.eq.s32.totalorder %v1593_v62, %v1828_v25  ;;  %1217 = vmatpush3.bf16.msra.mxu1 %v1216_v18 }
  0xc9   :  { %vm1844_vm11 = vmor %vm1800_vm5, %vm123_vm7  ;;  %1219 = vmatprep.subr.bf16.mxu1 %v1218_v20  ;;  %v229_v20 = vpop.permute.xlu0 %228 }
  0xca   :  { %vm1861_vm0 = vmor %vm1835_vm10, %vm133_vm12  ;;  %v1869_v47 = vpop.permute.xlu1 %173  ;;  %vm155_vm10 = vcmp.eq.s32.totalorder %v1600_v7, %v1828_v25  ;;  %1145 = vmatpush1.bf16.msra.mxu0 %v1144_v40 }
  0xcb   :  { %vm135_vm1 = vmor %vm1813_vm8, %vm131_vm13  ;;  %1147 = vmatprep.subr.bf16.mxu0 %v1146_v49 }
  0xcc   :  { %vm1876_vm4 = vmor %vm135_vm1, %vm142_vm14  ;;  %1221 = vmatpush3.bf16.msra.mxu1 %v1220_v30  ;;  %v2448_v30 = vmov 0 }
  0xcd   :  { %vm138_vm5 = vmor %vm1844_vm11, %vm134_vm15  ;;  %vm156_vm11 = vcmp.eq.s32.totalorder %v1606_v13, %v1828_v25  ;;  %vm166_vm15 = vcmp.eq.s32.totalorder %v1600_v7, %v1910_v2  ;;  %1223 = vmatprep.subr.bf16.mxu1 %v1222_v39  ;;  %v262_v27 = vpop.permute.xlu0 %261 }
  0xce   :  { %vm1892_vm7 = vmor %vm1861_vm0, %vm144_vm2  ;;  %vm167_vm0 = vcmp.eq.s32.totalorder %v1606_v13, %v1910_v2  ;;  %vm177_vm2 = vcmp.eq.s32.totalorder %v1600_v7, %v1869_v47  ;;  %1149 = vmatpush1.bf16.msra.mxu0 %v1148_v58  ;;  %v2468_v58 = vmov 0 }
  0xcf   :  { %vm1896_vm8 = vmor %vm138_vm5, %vm145_vm3  ;;  %v1912_v6 = vpop.permute.xlu1 %184  ;;  %vm178_vm3 = vcmp.eq.s32.totalorder %v1606_v13, %v1869_v47  ;;  %vm132_vm5 = vcmp.eq.s32.totalorder %v1597_v4, %v1817_v21  ;;  %1151 = vmatprep.subr.bf16.mxu0 %v1150_v0  ;;  %v675_v0 = vld [vmem:[#allocation5 + $0x318] sm:$0xff] }
  0xd0   :  { %vm1906_vm12 = vmor %vm1876_vm4, %vm153_vm6  ;;  %1225 = vmatpush3.bf16.msra.mxu1 %v1224_v44  ;;  %v1156_v10 = vpack.c.bf16 %v675_v0, %v672_v61  ;;  %v709_v61 = vld [vmem:[#allocation5 + $0x428] sm:$0xff]  ;;  %v712_v0 = vld [vmem:[#allocation5 + $0x440] sm:$0xff] }
  0xd1   :  { %vm1919_vm13 = vmor %vm1892_vm7, %vm155_vm10  ;;  %vm143_vm10 = vcmp.eq.s32.totalorder %v1597_v4, %v1773_v1  ;;  %1227 = vmatprep.subr.bf16.mxu1 %v1226_v24  ;;  %v1230_v1 = vpack.c.bf16 %v671_v5, %v668_v3  ;;  %v295_v31 = vpop.permute.xlu0 %294  ;;  %v1500_v3 = vmov 0.0   ;;  %v674_v5 = vld [vmem:[#allocation5 + $0x310] sm:$0xff] }
  0xd2   :  { %vm1928_vm14 = vmor %vm1896_vm8, %vm156_vm11  ;;  %vm188_vm8 = vcmp.eq.s32.totalorder %v1600_v7, %v1912_v6  ;;  %1153 = vmatpush1.bf16.msra.mxu0 %v1152_v17  ;;  %v1235_v11 = vpack.c.bf16 %v677_v8, %v674_v5  ;;  %v708_v8 = vld [vmem:[#allocation5 + $0x420] sm:$0xff] }
  0xd3   :  { %vm1938_vm1 = vmor %vm1919_vm13, %vm166_vm15  ;;  %vm154_vm13 = vcmp.eq.s32.totalorder %v1597_v4, %v1828_v25  ;;  %v620_v25 = vld [vmem:[#allocation5 + $0x160] sm:$0xff]  ;;  %1155 = vmatprep.subr.bf16.mxu0 %v1154_v19  ;;  %v1238_v19 = vpack.c.bf16 %v683_v14, %v680_v63 }
  0xd4   :  { %v1944_v33 = vpop.permute.xlu1 %206  ;;  %vm171_vm4 = vmor %vm1928_vm14, %vm167_vm0  ;;  %vm164_vm14 = vcmp.eq.s32.totalorder %v1593_v62, %v1910_v2  ;;  %vm199_vm0 = vcmp.eq.s32.totalorder %v1600_v7, %v1975_v52  ;;  %1229 = vmatpush3.bf16.msra.mxu1 %v1228_v59  ;;  %v1232_v18 = vpack.c.bf16 %v623_v12, %v620_v25  ;;  %v678_v25 = vld [vmem:[#allocation5 + $0x330] sm:$0xff]  ;;  %v681_v12 = vld [vmem:[#allocation5 + $0x348] sm:$0xff] }
  0xd5   :  { %vm1960_vm6 = vmor %vm1938_vm1, %vm177_vm2  ;;  %vm165_vm2 = vcmp.eq.s32.totalorder %v1597_v4, %v1910_v2  ;;  %1231 = vmatprep.subr.bf16.mxu1 %v1230_v1  ;;  %v328_v35 = vpop.permute.xlu0 %327  ;;  %v679_v1 = vld [vmem:[#allocation5 + $0x338] sm:$0xff] }
  0xd6   :  { %vm1967_vm7 = vmor %vm171_vm4, %vm178_vm3  ;;  %vm175_vm4 = vcmp.eq.s32.totalorder %v1593_v62, %v1869_v47 }
  0xd7   :  { %vm136_vm11 = vmor %vm1824_vm9, %vm132_vm5  ;;  %vm176_vm5 = vcmp.eq.s32.totalorder %v1597_v4, %v1869_v47  ;;  %v1499_v47 = vmov 0.0|0.0  }
  0xd8   :  { %vm1993_vm15 = vmor %vm1960_vm6, %vm188_vm8  ;;  %vm210_vm8 = vcmp.eq.s32.totalorder %v1600_v7, %v1944_v33  ;;  %1233 = vmatpush3.bf16.msra.mxu1 %v1232_v18  ;;  %v1160_v18 = vpack.c.bf16 %v681_v12, %v678_v25  ;;  %v715_v25 = vld [vmem:[#allocation5 + $0x458] sm:$0xff]  ;;  %v718_v12 = vld [vmem:[#allocation5 + $0x470] sm:$0xff] }
  0xd9   :  { %v1984_v55 = vpop.permute.xlu1 %217  ;;  %vm147_vm9 = vmor %vm136_vm11, %vm143_vm10  ;;  %vm186_vm11 = vcmp.eq.s32.totalorder %v1593_v62, %v1912_v6  ;;  %1234 = vmatprep.subr.bf16.mxu1 %v1499_v47  ;;  %v361_v39 = vpop.permute.xlu0 %360 }
  0xda   :  { %vm2005_vm1 = vmor %vm147_vm9, %vm154_vm13 }
  0xdb   :  { %vm2016_vm3 = vmor %vm1906_vm12, %vm164_vm14  ;;  %vm187_vm14 = vcmp.eq.s32.totalorder %v1597_v4, %v1912_v6 }
  0xdc   :  { %vm2029_vm6 = vmor %vm1993_vm15, %vm199_vm0  ;;  %vm189_vm15 = vcmp.eq.s32.totalorder %v1606_v13, %v1912_v6  ;;  %v2442_v6 = vmov 0 }
  0xdd   :  { %vm169_vm12 = vmor %vm2005_vm1, %vm165_vm2  ;;  %vm221_vm1 = vcmp.eq.s32.totalorder %v1600_v7, %v1984_v55 }
  0xde   :  { %v2040_v16 = vpop.permute.xlu1 %239  ;;  %vm179_vm10 = vmor %vm2016_vm3, %vm175_vm4  ;;  %vm197_vm3 = vcmp.eq.s32.totalorder %v1593_v62, %v1975_v52  ;;  %v394_v43 = vpop.permute.xlu0 %393 }
  0xdf   :  { %vm180_vm13 = vmor %vm169_vm12, %vm176_vm5  ;;  %vm198_vm5 = vcmp.eq.s32.totalorder %v1597_v4, %v1975_v52 }
  0xe0   :  { %vm214_vm9 = vmor %vm2029_vm6, %vm210_vm8  ;;  %vm200_vm6 = vcmp.eq.s32.totalorder %v1606_v13, %v1975_v52 }
  0xe1   :  { %vm190_vm0 = vmor %vm179_vm10, %vm186_vm11  ;;  %vm208_vm10 = vcmp.eq.s32.totalorder %v1593_v62, %v1944_v33 }
  0xe2   :  { %vm191_vm2 = vmor %vm180_vm13, %vm187_vm14  ;;  %vm211_vm14 = vcmp.eq.s32.totalorder %v1606_v13, %v1944_v33 }
  0xe3   :  { %vm193_vm4 = vmor %vm1967_vm7, %vm189_vm15  ;;  %v251_v2 = vpop.permute.xlu1 %250  ;;  %vm209_vm7 = vcmp.eq.s32.totalorder %v1597_v4, %v1944_v33  ;;  %v427_v48 = vpop.permute.xlu0 %426 }
  0xe4   :  { %vm2066_vm12 = vmor %vm214_vm9, %vm221_vm1  ;;  %vm232_vm1 = vcmp.eq.s32.totalorder %v1600_v7, %v229_v20 }
  0xe5   :  { %v2443_v6 = vsel %vm2066_vm12, 4294967295, %v2442_v6  ;;  %vm201_vm8 = vmor %vm190_vm0, %vm197_vm3  ;;  %vm243_vm12 = vcmp.eq.s32.totalorder %v1600_v7, %v2040_v16  ;;  %vm219_vm3 = vcmp.eq.s32.totalorder %v1593_v62, %v1984_v55 }
  0xe6   :  { %vm202_vm11 = vmor %vm191_vm2, %vm198_vm5  ;;  %vm220_vm2 = vcmp.eq.s32.totalorder %v1597_v4, %v1984_v55 }
  0xe7   :  { %vm204_vm13 = vmor %vm193_vm4, %vm200_vm6  ;;  %vm2444_vm4 = vnez %v2443_v6  ;;  %vm222_vm6 = vcmp.eq.s32.totalorder %v1606_v13, %v1984_v55 }
  0xe8   :  { %vm212_vm15 = vmor %vm201_vm8, %vm208_vm10  ;;  %v273_v22 = vpop.permute.xlu1 %272  ;;  %v460_v52 = vpop.permute.xlu0 %459 }
  0xe9   :  { %vm213_vm9 = vmor %vm202_vm11, %vm209_vm7  ;;  %vm254_vm11 = vcmp.eq.s32.totalorder %v1600_v7, %v251_v2 }
  0xea   :  { %vm215_vm0 = vmor %vm204_vm13, %vm211_vm14  ;;  %vm230_vm13 = vcmp.eq.s32.totalorder %v1593_v62, %v229_v20 }
  0xeb   :  { %vm236_vm5 = vmor %vm2444_vm4, %vm232_vm1  ;;  %vm231_vm1 = vcmp.eq.s32.totalorder %v1597_v4, %v229_v20  ;;  %vm233_vm4 = vcmp.eq.s32.totalorder %v1606_v13, %v229_v20  ;;  %v687_v20 = vld [vmem:[#allocation5 + $0x378] sm:$0xff] }
  0xec   :  { %vm247_vm8 = vmor %vm236_vm5, %vm243_vm12 }
  0xed   :  { %vm223_vm10 = vmor %vm212_vm15, %vm219_vm3  ;;  %v284_v23 = vpop.permute.xlu1 %283  ;;  %vm241_vm3 = vcmp.eq.s32.totalorder %v1593_v62, %v2040_v16  ;;  %v2234_v56 = vpop.permute.xlu0 %492 }
  0xee   :  { %vm224_vm7 = vmor %vm213_vm9, %vm220_vm2  ;;  %vm242_vm9 = vcmp.eq.s32.totalorder %v1597_v4, %v2040_v16 }
  0xef   :  { %vm226_vm14 = vmor %vm215_vm0, %vm222_vm6  ;;  %vm244_vm0 = vcmp.eq.s32.totalorder %v1606_v13, %v2040_v16  ;;  %v685_v16 = vld [vmem:[#allocation5 + $0x368] sm:$0xff] }
  0xf0   :  { %vm2091_vm5 = vmor %vm247_vm8, %vm254_vm11  ;;  %vm265_vm8 = vcmp.eq.s32.totalorder %v1600_v7, %v262_v27 }
  0xf1   :  { %v2446_v26 = vsel %vm2091_vm5, 4294967295, %v2445_v26  ;;  %vm234_vm12 = vmor %vm223_vm10, %vm230_vm13  ;;  %vm276_vm5 = vcmp.eq.s32.totalorder %v1600_v7, %v273_v22  ;;  %vm252_vm13 = vcmp.eq.s32.totalorder %v1593_v62, %v251_v2 }
  0xf2   :  { %vm235_vm15 = vmor %vm224_vm7, %vm231_vm1  ;;  %v306_v28 = vpop.permute.xlu1 %305  ;;  %vm253_vm1 = vcmp.eq.s32.totalorder %v1597_v4, %v251_v2  ;;  %vm2447_vm7 = vnez %v2446_v26  ;;  %v2250_v21 = vpop.permute.xlu0 %525  ;;  %v691_v26 = vld [vmem:[#allocation5 + $0x398] sm:$0xff] }
  0xf3   :  { %vm237_vm2 = vmor %vm226_vm14, %vm233_vm4  ;;  %vm255_vm14 = vcmp.eq.s32.totalorder %v1606_v13, %v251_v2  ;;  %v684_v2 = vld [vmem:[#allocation5 + $0x360] sm:$0xff] }
  0xf4   :  { %vm245_vm6 = vmor %vm234_vm12, %vm241_vm3 }
  0xf5   :  { %vm246_vm11 = vmor %vm235_vm15, %vm242_vm9  ;;  %vm287_vm9 = vcmp.eq.s32.totalorder %v1600_v7, %v284_v23 }
  0xf6   :  { %vm248_vm10 = vmor %vm237_vm2, %vm244_vm0  ;;  %vm263_vm0 = vcmp.eq.s32.totalorder %v1593_v62, %v262_v27 }
  0xf7   :  { %vm269_vm4 = vmor %vm2447_vm7, %vm265_vm8  ;;  %vm264_vm7 = vcmp.eq.s32.totalorder %v1597_v4, %v262_v27  ;;  %v317_v29 = vpop.permute.xlu1 %316  ;;  %vm266_vm8 = vcmp.eq.s32.totalorder %v1606_v13, %v262_v27  ;;  %v2272_v59 = vpop.permute.xlu0 %558  ;;  %v694_v27 = vld [vmem:[#allocation5 + $0x3b0] sm:$0xff] }
  0xf8   :  { %vm280_vm3 = vmor %vm269_vm4, %vm276_vm5 }
  0xf9   :  { %vm256_vm12 = vmor %vm245_vm6, %vm252_vm13  ;;  %vm274_vm6 = vcmp.eq.s32.totalorder %v1593_v62, %v273_v22 }
  0xfa   :  { %vm257_vm15 = vmor %vm246_vm11, %vm253_vm1  ;;  %vm275_vm1 = vcmp.eq.s32.totalorder %v1597_v4, %v273_v22 }
  0xfb   :  { %vm259_vm2 = vmor %vm248_vm10, %vm255_vm14  ;;  %vm277_vm10 = vcmp.eq.s32.totalorder %v1606_v13, %v273_v22  ;;  %v686_v22 = vld [vmem:[#allocation5 + $0x370] sm:$0xff] }
  0xfc   :  { %vm2112_vm4 = vmor %vm280_vm3, %vm287_vm9  ;;  %vm298_vm3 = vcmp.eq.s32.totalorder %v1600_v7, %v295_v31  ;;  %v339_v32 = vpop.permute.xlu1 %338 }
  0xfd   :  { %v2449_v30 = vsel %vm2112_vm4, 4294967295, %v2448_v30  ;;  %vm267_vm5 = vmor %vm256_vm12, %vm263_vm0  ;;  %vm309_vm4 = vcmp.eq.s32.totalorder %v1600_v7, %v306_v28  ;;  %vm285_vm12 = vcmp.eq.s32.totalorder %v1593_v62, %v284_v23 }
  0xfe   :  { %vm268_vm13 = vmor %vm257_vm15, %vm264_vm7  ;;  %vm286_vm7 = vcmp.eq.s32.totalorder %v1597_v4, %v284_v23  ;;  %vm2450_vm15 = vnez %v2449_v30  ;;  %v690_v30 = vld [vmem:[#allocation5 + $0x390] sm:$0xff] }
  0xff   :  { %vm270_vm11 = vmor %vm259_vm2, %vm266_vm8  ;;  %vm288_vm8 = vcmp.eq.s32.totalorder %v1606_v13, %v284_v23  ;;  %v689_v23 = vld [vmem:[#allocation5 + $0x388] sm:$0xff] }
 0x100   :  { %vm278_vm14 = vmor %vm267_vm5, %vm274_vm6 }
 0x101   :  { %vm279_vm9 = vmor %vm268_vm13, %vm275_vm1  ;;  %vm320_vm1 = vcmp.eq.s32.totalorder %v1600_v7, %v317_v29  ;;  %v350_v33 = vpop.permute.xlu1 %349 }
 0x102   :  { %vm281_vm0 = vmor %vm270_vm11, %vm277_vm10  ;;  %vm296_vm10 = vcmp.eq.s32.totalorder %v1593_v62, %v295_v31 }
 0x103   :  { %vm302_vm2 = vmor %vm2450_vm15, %vm298_vm3  ;;  %vm297_vm3 = vcmp.eq.s32.totalorder %v1597_v4, %v295_v31  ;;  %vm299_vm15 = vcmp.eq.s32.totalorder %v1606_v13, %v295_v31  ;;  %v1166_v31 = vpack.c.bf16 %v694_v27, %v691_v26  ;;  %v722_v26 = vld [vmem:[#allocation5 + $0x490] sm:$0xff]  ;;  %v725_v27 = vld [vmem:[#allocation5 + $0x4a8] sm:$0xff] }
 0x104   :  { %vm313_vm5 = vmor %vm302_vm2, %vm309_vm4 }
 0x105   :  { %vm289_vm6 = vmor %vm278_vm14, %vm285_vm12  ;;  %vm307_vm12 = vcmp.eq.s32.totalorder %v1593_v62, %v306_v28 }
 0x106   :  { %vm290_vm13 = vmor %vm279_vm9, %vm286_vm7  ;;  %vm308_vm7 = vcmp.eq.s32.totalorder %v1597_v4, %v306_v28  ;;  %v372_v36 = vpop.permute.xlu1 %371 }
 0x107   :  { %vm292_vm11 = vmor %vm281_vm0, %vm288_vm8  ;;  %vm310_vm0 = vcmp.eq.s32.totalorder %v1606_v13, %v306_v28  ;;  %v1164_v28 = vpack.c.bf16 %v687_v20, %v684_v2  ;;  %v720_v20 = vld [vmem:[#allocation5 + $0x480] sm:$0xff] }
 0x108   :  { %vm2130_vm2 = vmor %vm313_vm5, %vm320_vm1  ;;  %vm331_vm1 = vcmp.eq.s32.totalorder %v1600_v7, %v328_v35 }
 0x109   :  { %v2452_v34 = vsel %vm2130_vm2, 4294967295, %v2451_v34  ;;  %vm300_vm4 = vmor %vm289_vm6, %vm296_vm10  ;;  %vm342_vm2 = vcmp.eq.s32.totalorder %v1600_v7, %v339_v32  ;;  %vm318_vm10 = vcmp.eq.s32.totalorder %v1593_v62, %v317_v29 }
 0x10a   :  { %vm301_vm14 = vmor %vm290_vm13, %vm297_vm3  ;;  %vm319_vm3 = vcmp.eq.s32.totalorder %v1597_v4, %v317_v29  ;;  %vm2453_vm13 = vnez %v2452_v34  ;;  %v695_v34 = vld [vmem:[#allocation5 + $0x3b8] sm:$0xff] }
 0x10b   :  { %vm303_vm9 = vmor %vm292_vm11, %vm299_vm15  ;;  %vm321_vm15 = vcmp.eq.s32.totalorder %v1606_v13, %v317_v29  ;;  %v383_v37 = vpop.permute.xlu1 %382  ;;  %v1241_v29 = vpack.c.bf16 %v689_v23, %v686_v22  ;;  %v723_v23 = vld [vmem:[#allocation5 + $0x498] sm:$0xff] }
 0x10c   :  { %vm311_vm8 = vmor %vm300_vm4, %vm307_vm12 }
 0x10d   :  { %vm312_vm5 = vmor %vm301_vm14, %vm308_vm7  ;;  %vm353_vm7 = vcmp.eq.s32.totalorder %v1600_v7, %v350_v33 }
 0x10e   :  { %vm314_vm6 = vmor %vm303_vm9, %vm310_vm0  ;;  %vm329_vm0 = vcmp.eq.s32.totalorder %v1593_v62, %v328_v35 }
 0x10f   :  { %vm335_vm11 = vmor %vm2453_vm13, %vm331_vm1  ;;  %vm330_vm1 = vcmp.eq.s32.totalorder %v1597_v4, %v328_v35  ;;  %vm332_vm13 = vcmp.eq.s32.totalorder %v1606_v13, %v328_v35  ;;  %v697_v35 = vld [vmem:[#allocation5 + $0x3c8] sm:$0xff] }
 0x110   :  { %vm346_vm4 = vmor %vm335_vm11, %vm342_vm2  ;;  %v405_v40 = vpop.permute.xlu1 %404 }
 0x111   :  { %vm322_vm12 = vmor %vm311_vm8, %vm318_vm10  ;;  %vm340_vm8 = vcmp.eq.s32.totalorder %v1593_v62, %v339_v32 }
 0x112   :  { %vm323_vm14 = vmor %vm312_vm5, %vm319_vm3  ;;  %vm341_vm3 = vcmp.eq.s32.totalorder %v1597_v4, %v339_v32 }
 0x113   :  { %vm325_vm9 = vmor %vm314_vm6, %vm321_vm15  ;;  %vm343_vm6 = vcmp.eq.s32.totalorder %v1606_v13, %v339_v32  ;;  %v693_v32 = vld [vmem:[#allocation5 + $0x3a8] sm:$0xff] }
 0x114   :  { %vm2148_vm2 = vmor %vm346_vm4, %vm353_vm7  ;;  %vm364_vm4 = vcmp.eq.s32.totalorder %v1600_v7, %v361_v39 }
 0x115   :  { %v2455_v38 = vsel %vm2148_vm2, 4294967295, %v2454_v38  ;;  %vm333_vm11 = vmor %vm322_vm12, %vm329_vm0  ;;  %vm375_vm2 = vcmp.eq.s32.totalorder %v1600_v7, %v372_v36  ;;  %vm351_vm12 = vcmp.eq.s32.totalorder %v1593_v62, %v350_v33  ;;  %v416_v41 = vpop.permute.xlu1 %415 }
 0x116   :  { %vm334_vm10 = vmor %vm323_vm14, %vm330_vm1  ;;  %vm352_vm1 = vcmp.eq.s32.totalorder %v1597_v4, %v350_v33  ;;  %vm2456_vm14 = vnez %v2455_v38 }
 0x117   :  { %vm336_vm5 = vmor %vm325_vm9, %vm332_vm13  ;;  %vm354_vm13 = vcmp.eq.s32.totalorder %v1606_v13, %v350_v33  ;;  %v692_v33 = vld [vmem:[#allocation5 + $0x3a0] sm:$0xff] }
 0x118   :  { %vm344_vm15 = vmor %vm333_vm11, %vm340_vm8  ;;  %v1244_v38 = vpack.c.bf16 %v695_v34, %v692_v33  ;;  %v729_v34 = vld [vmem:[#allocation5 + $0x4c8] sm:$0xff] }
 0x119   :  { %vm345_vm7 = vmor %vm334_vm10, %vm341_vm3  ;;  %vm386_vm3 = vcmp.eq.s32.totalorder %v1600_v7, %v383_v37 }
 0x11a   :  { %vm347_vm0 = vmor %vm336_vm5, %vm343_vm6  ;;  %vm362_vm5 = vcmp.eq.s32.totalorder %v1593_v62, %v361_v39  ;;  %v438_v44 = vpop.permute.xlu1 %437 }
 0x11b   :  { %vm368_vm9 = vmor %vm2456_vm14, %vm364_vm4  ;;  %vm363_vm4 = vcmp.eq.s32.totalorder %v1597_v4, %v361_v39  ;;  %vm365_vm14 = vcmp.eq.s32.totalorder %v1606_v13, %v361_v39  ;;  %v696_v39 = vld [vmem:[#allocation5 + $0x3c0] sm:$0xff] }
 0x11c   :  { %vm379_vm8 = vmor %vm368_vm9, %vm375_vm2 }
 0x11d   :  { %vm355_vm11 = vmor %vm344_vm15, %vm351_vm12  ;;  %vm373_vm12 = vcmp.eq.s32.totalorder %v1593_v62, %v372_v36 }
 0x11e   :  { %vm356_vm10 = vmor %vm345_vm7, %vm352_vm1  ;;  %vm374_vm1 = vcmp.eq.s32.totalorder %v1597_v4, %v372_v36 }
 0x11f   :  { %vm358_vm6 = vmor %vm347_vm0, %vm354_vm13  ;;  %vm376_vm0 = vcmp.eq.s32.totalorder %v1606_v13, %v372_v36  ;;  %v449_v45 = vpop.permute.xlu1 %448  ;;  %v700_v36 = vld [vmem:[#allocation5 + $0x3e0] sm:$0xff] }
 0x120   :  { %vm2166_vm2 = vmor %vm379_vm8, %vm386_vm3  ;;  %vm397_vm3 = vcmp.eq.s32.totalorder %v1600_v7, %v394_v43 }
 0x121   :  { %v2458_v42 = vsel %vm2166_vm2, 4294967295, %v2457_v42  ;;  %vm366_vm9 = vmor %vm355_vm11, %vm362_vm5  ;;  %vm408_vm2 = vcmp.eq.s32.totalorder %v1600_v7, %v405_v40  ;;  %vm384_vm11 = vcmp.eq.s32.totalorder %v1593_v62, %v383_v37 }
 0x122   :  { %vm367_vm15 = vmor %vm356_vm10, %vm363_vm4  ;;  %vm385_vm4 = vcmp.eq.s32.totalorder %v1597_v4, %v383_v37  ;;  %vm2459_vm10 = vnez %v2458_v42  ;;  %v698_v42 = vld [vmem:[#allocation5 + $0x3d0] sm:$0xff] }
 0x123   :  { %vm369_vm7 = vmor %vm358_vm6, %vm365_vm14  ;;  %vm387_vm14 = vcmp.eq.s32.totalorder %v1606_v13, %v383_v37  ;;  %v1168_v37 = vpack.c.bf16 %v693_v32, %v690_v30  ;;  %v1188_v30 = vpack.c.bf16 %v723_v23, %v720_v20  ;;  %v726_v32 = vld [vmem:[#allocation5 + $0x4b0] sm:$0xff] }
 0x124   :  { %vm377_vm13 = vmor %vm366_vm9, %vm373_vm12  ;;  %v471_v49 = vpop.permute.xlu1 %470 }
 0x125   :  { %vm378_vm8 = vmor %vm367_vm15, %vm374_vm1  ;;  %vm419_vm1 = vcmp.eq.s32.totalorder %v1600_v7, %v416_v41 }
 0x126   :  { %vm380_vm5 = vmor %vm369_vm7, %vm376_vm0  ;;  %vm395_vm0 = vcmp.eq.s32.totalorder %v1593_v62, %v394_v43 }
 0x127   :  { %vm401_vm6 = vmor %vm2459_vm10, %vm397_vm3  ;;  %vm396_vm3 = vcmp.eq.s32.totalorder %v1597_v4, %v394_v43  ;;  %vm398_vm10 = vcmp.eq.s32.totalorder %v1606_v13, %v394_v43  ;;  %v701_v43 = vld [vmem:[#allocation5 + $0x3e8] sm:$0xff] }
 0x128   :  { %vm412_vm9 = vmor %vm401_vm6, %vm408_vm2 }
 0x129   :  { %vm388_vm12 = vmor %vm377_vm13, %vm384_vm11  ;;  %vm406_vm11 = vcmp.eq.s32.totalorder %v1593_v62, %v405_v40  ;;  %v2201_v50 = vpop.permute.xlu1 %481 }
 0x12a   :  { %vm389_vm15 = vmor %vm378_vm8, %vm385_vm4  ;;  %vm407_vm4 = vcmp.eq.s32.totalorder %v1597_v4, %v405_v40 }
 0x12b   :  { %vm391_vm7 = vmor %vm380_vm5, %vm387_vm14  ;;  %vm409_vm5 = vcmp.eq.s32.totalorder %v1606_v13, %v405_v40  ;;  %v1170_v40 = vpack.c.bf16 %v700_v36, %v697_v35  ;;  %v728_v35 = vld [vmem:[#allocation5 + $0x4c0] sm:$0xff]  ;;  %v731_v36 = vld [vmem:[#allocation5 + $0x4d8] sm:$0xff] }
 0x12c   :  { %vm2184_vm2 = vmor %vm412_vm9, %vm419_vm1  ;;  %vm430_vm1 = vcmp.eq.s32.totalorder %v1600_v7, %v427_v48 }
 0x12d   :  { %v2461_v46 = vsel %vm2184_vm2, 4294967295, %v2460_v46  ;;  %vm399_vm6 = vmor %vm388_vm12, %vm395_vm0  ;;  %vm441_vm2 = vcmp.eq.s32.totalorder %v1600_v7, %v438_v44  ;;  %vm417_vm12 = vcmp.eq.s32.totalorder %v1593_v62, %v416_v41 }
 0x12e   :  { %vm400_vm13 = vmor %vm389_vm15, %vm396_vm3  ;;  %vm418_vm3 = vcmp.eq.s32.totalorder %v1597_v4, %v416_v41  ;;  %vm2462_vm15 = vnez %v2461_v46  ;;  %v2213_v53 = vpop.permute.xlu1 %503 }
 0x12f   :  { %vm402_vm8 = vmor %vm391_vm7, %vm398_vm10  ;;  %vm420_vm10 = vcmp.eq.s32.totalorder %v1606_v13, %v416_v41  ;;  %v699_v41 = vld [vmem:[#allocation5 + $0x3d8] sm:$0xff] }
 0x130   :  { %vm410_vm14 = vmor %vm399_vm6, %vm406_vm11  ;;  %v1172_v46 = vpack.c.bf16 %v699_v41, %v696_v39  ;;  %v1262_v39 = vpack.c.bf16 %v731_v36, %v728_v35  ;;  %v735_v41 = vld [vmem:[#allocation5 + $0x4f8] sm:$0xff] }
 0x131   :  { %vm411_vm9 = vmor %vm400_vm13, %vm407_vm4  ;;  %vm452_vm4 = vcmp.eq.s32.totalorder %v1600_v7, %v449_v45 }
 0x132   :  { %vm413_vm0 = vmor %vm402_vm8, %vm409_vm5  ;;  %vm428_vm5 = vcmp.eq.s32.totalorder %v1593_v62, %v427_v48 }
 0x133   :  { %vm434_vm7 = vmor %vm2462_vm15, %vm430_vm1  ;;  %vm429_vm1 = vcmp.eq.s32.totalorder %v1597_v4, %v427_v48  ;;  %vm431_vm15 = vcmp.eq.s32.totalorder %v1606_v13, %v427_v48  ;;  %v2227_v55 = vpop.permute.xlu1 %514  ;;  %v1247_v48 = vpack.c.bf16 %v701_v43, %v698_v42  ;;  %v737_v42 = vld [vmem:[#allocation5 + $0x508] sm:$0xff]  ;;  %v739_v43 = vld [vmem:[#allocation5 + $0x518] sm:$0xff] }
 0x134   :  { %vm445_vm6 = vmor %vm434_vm7, %vm441_vm2 }
 0x135   :  { %vm421_vm11 = vmor %vm410_vm14, %vm417_vm12  ;;  %vm439_vm12 = vcmp.eq.s32.totalorder %v1593_v62, %v438_v44 }
 0x136   :  { %vm422_vm13 = vmor %vm411_vm9, %vm418_vm3  ;;  %vm440_vm9 = vcmp.eq.s32.totalorder %v1597_v4, %v438_v44 }
 0x137   :  { %vm424_vm8 = vmor %vm413_vm0, %vm420_vm10  ;;  %vm442_vm0 = vcmp.eq.s32.totalorder %v1606_v13, %v438_v44  ;;  %v703_v44 = vld [vmem:[#allocation5 + $0x3f8] sm:$0xff] }
 0x138   :  { %vm2204_vm2 = vmor %vm445_vm6, %vm452_vm4  ;;  %vm463_vm4 = vcmp.eq.s32.totalorder %v1600_v7, %v460_v52  ;;  %v2240_v57 = vpop.permute.xlu1 %536 }
 0x139   :  { %v2464_v51 = vsel %vm2204_vm2, 4294967295, %v2463_v51  ;;  %vm432_vm7 = vmor %vm421_vm11, %vm428_vm5  ;;  %vm474_vm2 = vcmp.eq.s32.totalorder %v1600_v7, %v471_v49  ;;  %vm450_vm11 = vcmp.eq.s32.totalorder %v1593_v62, %v449_v45 }
 0x13a   :  { %vm433_vm14 = vmor %vm422_vm13, %vm429_vm1  ;;  %vm451_vm1 = vcmp.eq.s32.totalorder %v1597_v4, %v449_v45  ;;  %vm2465_vm13 = vnez %v2464_v51 }
 0x13b   :  { %vm435_vm3 = vmor %vm424_vm8, %vm431_vm15  ;;  %vm453_vm15 = vcmp.eq.s32.totalorder %v1606_v13, %v449_v45  ;;  %v706_v45 = vld [vmem:[#allocation5 + $0x410] sm:$0xff] }
 0x13c   :  { %vm443_vm10 = vmor %vm432_vm7, %vm439_vm12  ;;  %v1174_v51 = vpack.c.bf16 %v706_v45, %v703_v44  ;;  %v742_v44 = vld [vmem:[#allocation5 + $0x530] sm:$0xff] }
 0x13d   :  { %vm444_vm6 = vmor %vm433_vm14, %vm440_vm9  ;;  %vm461_vm14 = vcmp.eq.s32.totalorder %v1593_v62, %v460_v52  ;;  %v2256_v24 = vpop.permute.xlu1 %547 }
 0x13e   :  { %vm446_vm5 = vmor %vm435_vm3, %vm442_vm0  ;;  %vm462_vm0 = vcmp.eq.s32.totalorder %v1597_v4, %v460_v52 }
 0x13f   :  { %vm467_vm8 = vmor %vm2465_vm13, %vm463_vm4  ;;  %vm464_vm4 = vcmp.eq.s32.totalorder %v1606_v13, %v460_v52  ;;  %v705_v52 = vld [vmem:[#allocation5 + $0x408] sm:$0xff] }
 0x140   :  { %vm2220_vm7 = vmor %vm467_vm8, %vm474_vm2  ;;  %vm472_vm2 = vcmp.eq.s32.totalorder %v1593_v62, %v471_v49 }
 0x141   :  { %v2467_v54 = vsel %vm2220_vm7, 4294967295, %v2466_v54  ;;  %vm454_vm12 = vmor %vm443_vm10, %vm450_vm11  ;;  %vm473_vm7 = vcmp.eq.s32.totalorder %v1597_v4, %v471_v49  ;;  %vm475_vm11 = vcmp.eq.s32.totalorder %v1606_v13, %v471_v49  ;;  %v702_v49 = vld [vmem:[#allocation5 + $0x3f0] sm:$0xff] }
 0x142   :  { %vm455_vm9 = vmor %vm444_vm6, %vm451_vm1  ;;  %vm483_vm6 = vcmp.eq.s32.totalorder %v1593_v62, %v2201_v50 }
 0x143   :  { %vm457_vm3 = vmor %vm446_vm5, %vm453_vm15  ;;  %vm486_vm15 = vcmp.eq.s32.totalorder %v1606_v13, %v2201_v50 }
 0x144   :  { %vm465_vm13 = vmor %vm454_vm12, %vm461_vm14  ;;  %vm484_vm14 = vcmp.eq.s32.totalorder %v1597_v4, %v2201_v50 }
 0x145   :  { %vm466_vm8 = vmor %vm455_vm9, %vm462_vm0  ;;  %vm494_vm0 = vcmp.eq.s32.totalorder %v1593_v62, %v2234_v56 }
 0x146   :  { %vm468_vm10 = vmor %vm457_vm3, %vm464_vm4  ;;  %vm497_vm4 = vcmp.eq.s32.totalorder %v1606_v13, %v2234_v56 }
 0x147   :  { %vm476_vm1 = vmor %vm465_vm13, %vm472_vm2 }
 0x148   :  { %vm477_vm5 = vmor %vm466_vm8, %vm473_vm7  ;;  %vm508_vm7 = vcmp.eq.s32.totalorder %v1606_v13, %v2213_v53  ;;  %vm519_vm8 = vcmp.eq.s32.totalorder %v1606_v13, %v2227_v55 }
 0x149   :  { %vm479_vm12 = vmor %vm468_vm10, %vm475_vm11  ;;  %vm495_vm10 = vcmp.eq.s32.totalorder %v1597_v4, %v2234_v56 }
 0x14a   :  { %vm487_vm9 = vmor %vm476_vm1, %vm483_vm6  ;;  %vm505_vm1 = vcmp.eq.s32.totalorder %v1593_v62, %v2213_v53 }
 0x14b   :  { %vm490_vm3 = vmor %vm479_vm12, %vm486_vm15  ;;  %vm530_vm15 = vcmp.eq.s32.totalorder %v1606_v13, %v2250_v21 }
 0x14c   :  { %vm488_vm13 = vmor %vm477_vm5, %vm484_vm14  ;;  %vm541_vm14 = vcmp.eq.s32.totalorder %v1606_v13, %v2240_v57 }
 0x14d   :  { %vm498_vm2 = vmor %vm487_vm9, %vm494_vm0  ;;  %vm506_vm9 = vcmp.eq.s32.totalorder %v1597_v4, %v2213_v53 }
 0x14e   :  { %vm501_vm11 = vmor %vm490_vm3, %vm497_vm4  ;;  %vm552_vm3 = vcmp.eq.s32.totalorder %v1606_v13, %v2256_v24  ;;  %vm517_vm4 = vcmp.eq.s32.totalorder %v1597_v4, %v2227_v55 }
 0x14f   :  { %vm512_vm6 = vmor %vm501_vm11, %vm508_vm7  ;;  %vm539_vm11 = vcmp.eq.s32.totalorder %v1597_v4, %v2240_v57 }
 0x150   :  { %vm523_vm5 = vmor %vm512_vm6, %vm519_vm8  ;;  %vm550_vm6 = vcmp.eq.s32.totalorder %v1597_v4, %v2256_v24 }
 0x151   :  { %vm499_vm12 = vmor %vm488_vm13, %vm495_vm10  ;;  %vm528_vm13 = vcmp.eq.s32.totalorder %v1597_v4, %v2250_v21 }
 0x152   :  { %vm2264_vm0 = vmor %vm498_vm2, %vm505_vm1 }
 0x153   :  { %v2469_v58 = vsel %vm2264_vm0, 4294967295, %v2468_v58  ;;  %vm534_vm7 = vmor %vm523_vm5, %vm530_vm15  ;;  %vm561_vm5 = vcmp.eq.s32.totalorder %v1597_v4, %v2272_v59  ;;  %vm516_vm15 = vcmp.eq.s32.totalorder %v1593_v62, %v2227_v55 }
 0x154   :  { %vm545_vm8 = vmor %vm534_vm7, %vm541_vm14 }
 0x155   :  { %vm2276_vm10 = vmor %vm545_vm8, %vm552_vm3  ;;  %vm527_vm3 = vcmp.eq.s32.totalorder %v1593_v62, %v2250_v21  ;;  %vm2472_vm8 = vnez %v2469_v58  ;;  %v704_v58 = vld [vmem:[#allocation5 + $0x400] sm:$0xff] }
 0x156   :  { %vm510_vm2 = vmor %vm499_vm12, %vm506_vm9  ;;  %vm538_vm9 = vcmp.eq.s32.totalorder %v1593_v62, %v2240_v57  ;;  %v1250_v5 = vpack.c.bf16 %v707_v60, %v704_v58 }
 0x157   :  { %vm521_vm1 = vmor %vm510_vm2, %vm517_vm4  ;;  %vm549_vm4 = vcmp.eq.s32.totalorder %v1593_v62, %v2256_v24 }
 0x158   :  { %vm532_vm0 = vmor %vm521_vm1, %vm528_vm13 }
 0x159   :  { %vm543_vm14 = vmor %vm532_vm0, %vm539_vm11  ;;  %vm560_vm0 = vcmp.eq.s32.totalorder %v1593_v62, %v2272_v59  ;;  %vm563_vm11 = vcmp.eq.s32.totalorder %v1606_v13, %v2272_v59  ;;  %v1158_v62 = vpack.c.bf16 %v682_v9, %v679_v1  ;;  %v688_v13 = vld [vmem:[#allocation5 + $0x380] sm:$0xff]  ;;  %v1178_v1 = vpack.c.bf16 %v712_v0, %v709_v61  ;;  %v711_v9 = vld [vmem:[#allocation5 + $0x438] sm:$0xff] }
 0x15a   :  { %vm554_vm7 = vmor %vm543_vm14, %vm550_vm6  ;;  %vm744_vm14 = vcmask 523264   ;;  %v1162_v6 = vpack.c.bf16 %v688_v13, %v685_v16  ;;  %v1180_v63 = vpack.c.bf16 %v711_v9, %v708_v8  ;;  %v717_v16 = vld [vmem:[#allocation5 + $0x468] sm:$0xff]  ;;  %v716_v13 = vld [vmem:[#allocation5 + $0x460] sm:$0xff] }
 0x15b   :  { %vm565_vm12 = vmor %vm554_vm7, %vm561_vm5 }
 0x15c   :  { %v1050_v4 = vsel %vm565_vm12, 1.0, %v1500_v3  ;;  %vm520_vm13 = vmor %vm2472_vm8, %vm516_vm15  ;;  %vm496_vm12 = vcmp.eq.s32.totalorder %v1600_v7, %v2234_v56  ;;  %v734_v56 = vld [vmem:[#allocation5 + $0x4f0] sm:$0xff] }
 0x15d   :  { %812 = vmatprep.mubr.f32.mxu0 %v1050_v4  ;;  %954 = vmatprep.mubr.f32.mxu1 %v1050_v4  ;;  %vm531_vm2 = vmor %vm520_vm13, %vm527_vm3  ;;  %v1176_v4 = vpack.c.bf16 %v705_v52, %v702_v49  ;;  %vm2473_vm3 = vnez %v2467_v54  ;;  %v741_v49 = vld [vmem:[#allocation5 + $0x528] sm:$0xff]  ;;  %v743_v52 = vld [vmem:[#allocation5 + $0x538] sm:$0xff] }
 0x15e   :  { %vm542_vm1 = vmor %vm531_vm2, %vm538_vm9  ;;  %vm507_vm9 = vcmp.eq.s32.totalorder %v1600_v7, %v2213_v53  ;;  %vm529_vm2 = vcmp.eq.s32.totalorder %v1600_v7, %v2250_v21 }
 0x15f   :  { %vm553_vm6 = vmor %vm542_vm1, %vm549_vm4  ;;  %vm518_vm4 = vcmp.eq.s32.totalorder %v1600_v7, %v2227_v55  ;;  %vm551_vm1 = vcmp.eq.s32.totalorder %v1600_v7, %v2256_v24  ;;  %v1198_v55 = vpack.c.bf16 %v742_v44, %v739_v43 }
 0x160   :  { %vm564_vm5 = vmor %vm553_vm6, %vm560_vm0 }
 0x161   :  { %v1049_v15 = vsel %vm564_vm5, 1.0, %v1500_v3  ;;  %vm567_vm15 = vmor %vm2276_vm10, %vm563_vm11  ;;  %vm485_vm10 = vcmp.eq.s32.totalorder %v1600_v7, %v2201_v50  ;;  %v736_v50 = vld [vmem:[#allocation5 + $0x500] sm:$0xff]  ;;  %vm540_vm11 = vcmp.eq.s32.totalorder %v1600_v7, %v2240_v57 }
 0x162   :  { %813 = vmatmul.mubr.f32.vlgmr.msra.gmra.mrb[0].mxu0 %v1049_v15  ;;  %955 = vmatmul.mubr.f32.vlgmr.msra.gmra.mrb[0].mxu1 %v1049_v15  ;;  %v1052_v17 = vsel %vm567_vm15, 1.0, %v1500_v3  ;;  %v714_v15 = vld [vmem:[#allocation5 + $0x450] sm:$0xff]  ;;  %vm489_vm7 = vmor %vm2473_vm3, %vm485_vm10 }
 0x163   :  { %1157 = vmatpush1.bf16.msra.mxu0 %v1156_v10  ;;  %1236 = vmatpush1.bf16.msra.mxu1 %v1235_v11  ;;  %v710_v10 = vld [vmem:[#allocation5 + $0x430] sm:$0xff]  ;;  %v713_v11 = vld [vmem:[#allocation5 + $0x448] sm:$0xff]  ;;  %v1184_v2 = vpack.c.bf16 %v717_v16, %v714_v15  ;;  %vm500_vm8 = vmor %vm489_vm7, %vm496_vm12 }
 0x164   :  { %1053 = vmatprep.mubr.msk.f32.mxu0 %vm744_vm14, %v1052_v17  ;;  %1054 = vmatprep.mubr.msk.f32.mxu1 %vm744_vm14, %v1052_v17  ;;  %v1253_v14 = vpack.c.bf16 %v713_v11, %v710_v10  ;;  %v719_v17 = vld [vmem:[#allocation5 + $0x478] sm:$0xff]  ;;  %vm511_vm13 = vmor %vm500_vm8, %vm507_vm9  ;;  %vm562_vm14 = vcmp.eq.s32.totalorder %v1600_v7, %v2272_v59 }
 0x165   :  { %1159 = vmatprep.subr.bf16.mxu0 %v1158_v62  ;;  %1237 = vmatprep.subr.bf16.mxu1 %v1499_v47  ;;  %v1182_v62 = vpack.c.bf16 %v718_v12, %v715_v25  ;;  %vm2330_vm0 = vmor %vm511_vm13, %vm518_vm4 }
 0x166   :  { %vm533_vm6 = vmor %vm2330_vm0, %vm529_vm2 }
 0x167   :  { %1161 = vmatpush1.bf16.msra.mxu0 %v1160_v18  ;;  %1239 = vmatpush1.bf16.msra.mxu1 %v1238_v19  ;;  %v721_v18 = vld [vmem:[#allocation5 + $0x488] sm:$0xff]  ;;  %v724_v19 = vld [vmem:[#allocation5 + $0x4a0] sm:$0xff]  ;;  %vm544_vm5 = vmor %vm533_vm6, %vm540_vm11 }
 0x168   :  { %1163 = vmatprep.subr.bf16.mxu0 %v1162_v6  ;;  %1240 = vmatprep.subr.bf16.mxu1 %v1499_v47  ;;  %v1256_v6 = vpack.c.bf16 %v719_v17, %v716_v13  ;;  %v1186_v22 = vpack.c.bf16 %v724_v19, %v721_v18  ;;  %vm555_vm15 = vmor %vm544_vm5, %vm551_vm1 }
 0x169   :  { %vm566_vm10 = vmor %vm555_vm15, %vm562_vm14 }
 0x16a   :  { %v1051_v24 = vsel %vm566_vm10, 1.0, %v1500_v3 }
 0x16b   :  { %1165 = vmatpush1.bf16.msra.mxu0 %v1164_v28  ;;  %1242 = vmatpush1.bf16.msra.mxu1 %v1241_v29  ;;  %v727_v28 = vld [vmem:[#allocation5 + $0x4b8] sm:$0xff]  ;;  %v730_v29 = vld [vmem:[#allocation5 + $0x4d0] sm:$0xff] }
 0x16c   :  { %1167 = vmatprep.subr.bf16.mxu0 %v1166_v31  ;;  %1243 = vmatprep.subr.bf16.mxu1 %v1499_v47  ;;  %v1259_v31 = vpack.c.bf16 %v725_v27, %v722_v26  ;;  %v1190_v33 = vpack.c.bf16 %v730_v29, %v727_v28 }
 0x16f   :  { %1169 = vmatpush1.bf16.msra.mxu0 %v1168_v37  ;;  %1245 = vmatpush1.bf16.msra.mxu1 %v1244_v38  ;;  %v733_v37 = vld [vmem:[#allocation5 + $0x4e8] sm:$0xff]  ;;  %v1192_v38 = vpack.c.bf16 %v729_v34, %v726_v32 }
 0x170   :  { %1171 = vmatprep.subr.bf16.mxu0 %v1170_v40  ;;  %1246 = vmatprep.subr.bf16.mxu1 %v1499_v47  ;;  %v732_v40 = vld [vmem:[#allocation5 + $0x4e0] sm:$0xff]  ;;  %v1194_v54 = vpack.c.bf16 %v736_v50, %v733_v37 }
 0x171   :  { %v1196_v45 = vpack.c.bf16 %v735_v41, %v732_v40 }
 0x173   :  { %1173 = vmatpush1.bf16.msra.mxu0 %v1172_v46  ;;  %1248 = vmatpush1.bf16.msra.mxu1 %v1247_v48  ;;  %v1265_v46 = vpack.c.bf16 %v737_v42, %v734_v56  ;;  %v738_v48 = vld [vmem:[#allocation5 + $0x510] sm:$0xff] }
 0x174   :  { %1175 = vmatprep.subr.bf16.mxu0 %v1174_v51  ;;  %1249 = vmatprep.subr.bf16.mxu1 %v1499_v47  ;;  %v740_v51 = vld [vmem:[#allocation5 + $0x520] sm:$0xff]  ;;  %v1200_v57 = vpack.c.bf16 %v741_v49, %v738_v48 }
 0x175   :  { %v1268_v21 = vpack.c.bf16 %v743_v52, %v740_v51 }
 0x177   :  { %1177 = vmatpush1.bf16.msra.mxu0 %v1176_v4  ;;  %1251 = vmatpush1.bf16.msra.mxu1 %v1250_v5 }
 0x178   :  { %1179 = vmatprep.subr.bf16.mxu0 %v1178_v1  ;;  %1252 = vmatprep.subr.bf16.mxu1 %v1499_v47 }
 0x17b   :  { %1181 = vmatpush1.bf16.msra.mxu0 %v1180_v63  ;;  %1254 = vmatpush1.bf16.msra.mxu1 %v1253_v14 }
 0x17c   :  { %1183 = vmatprep.subr.bf16.mxu0 %v1182_v62  ;;  %1255 = vmatprep.subr.bf16.mxu1 %v1499_v47 }
 0x17f   :  { %1185 = vmatpush1.bf16.msra.mxu0 %v1184_v2  ;;  %1257 = vmatpush1.bf16.msra.mxu1 %v1256_v6 }
 0x180   :  { %1187 = vmatprep.subr.bf16.mxu0 %v1186_v22  ;;  %1258 = vmatprep.subr.bf16.mxu1 %v1499_v47 }
 0x183   :  { %1189 = vmatpush1.bf16.msra.mxu0 %v1188_v30  ;;  %1260 = vmatpush1.bf16.msra.mxu1 %v1259_v31 }
 0x184   :  { %1191 = vmatprep.subr.bf16.mxu0 %v1190_v33  ;;  %1261 = vmatprep.subr.bf16.mxu1 %v1499_v47 }
 0x187   :  { %1193 = vmatpush1.bf16.msra.mxu0 %v1192_v38  ;;  %1263 = vmatpush1.bf16.msra.mxu1 %v1262_v39 }
 0x188   :  { %1195 = vmatprep.subr.bf16.mxu0 %v1194_v54  ;;  %1264 = vmatprep.subr.bf16.mxu1 %v1499_v47 }
 0x18b   :  { %1197 = vmatpush1.bf16.msra.mxu0 %v1196_v45  ;;  %1266 = vmatpush1.bf16.msra.mxu1 %v1265_v46 }
 0x18c   :  { %1199 = vmatprep.subr.bf16.mxu0 %v1198_v55  ;;  %1267 = vmatprep.subr.bf16.mxu1 %v1499_v47 }
 0x18f   :  { %1201 = vmatpush1.bf16.msra.mxu0 %v1200_v57  ;;  %1269 = vmatpush1.bf16.msra.mxu1 %v1268_v21 }
 0x192   :  { %884 = vmatmul.mubr.f32.vlgmr.msra.gmra.mrb[0].mxu0 %v1051_v24  ;;  %1025 = vmatmul.mubr.f32.vlgmr.msra.gmra.mrb[2].mxu1 %v1051_v24 }
 0x235   :  { %v1087_v58 = vpop.f32.mrb[0].mxu1 }
 0x236   :  { %v1088_v60 = vpop.f32.mrb[1].mxu1 }
 0x237   :  { %v1089_v61 = vadd.f32 %v1088_v60, %v1087_v58 }
 0x265   :  { %v885_v7 = vpop.f32.mrb[0].mxu0  ;;  %v1026_v59 = vpop.f32.mrb[2].mxu1 }
 0x266   :  { %1030 = vst [vmem:[#allocation7] sm:$0xff] %v885_v7  ;;  %v1027_v0 = vadd.f32 %v1089_v61, %v1026_v59  ;;  %v887_v4 = vpop.f32.mrb[1].mxu0  ;;  %v1028_v5 = vpop.f32.mrb[3].mxu1 }
 0x267   :  { %1031 = vst [vmem:[#allocation7 + $0x8] sm:$0xff] %v887_v4 }
 0x268   :  { %1032 = vst [vmem:[#allocation7 + $0x10] sm:$0xff] %v1027_v0 }
 0x269   :  { %1430 = shalt.err (!%p1427_p6)
}
 0x26a   :  { %s1431_s10 = scalar_lea.hbm %s2361_s2, 384 }
 0x26b   :  { %p1432_p7 = scmp.ne.s32.totalorder %s2361_s2, %s1431_s10  ;;  %p1435_p8 = scmp.lt.u32.totalorder %s1431_s10, %s2361_s2 }
 0x26d   :  { %p1437_p9 = pnand %p1435_p8, %p1432_p7 }
 0x26f   :  { %1440 = shalt.err (!%p1437_p9)
}
 0x270   :  { %1042 = dma.vmem_to_hbm [thread:$0]  %s1040_s6, 384, %s2361_s2, [#allocation4]  }
 0x271   :  { %1445 = dma.done.wait [#allocation4], 384  }
 0x272   :  { %1446 = vsyncadd [#allocation4], 4294966912 }
 0x273   :  { %1046 = vsyncpa [#allocation3], 1 }
 0x274   :  { %1047 = vsyncpa [#allocation6], 1 }
 0x275   :  { %1048 = vsyncpa [#allocation4], 1 }

</bundles_post_ra>
